<compile_context>
chip_gen: v7x
topology: tpu7x:2x2x1
jax: 0.10.0
libtpu: 0.0.40
codegen_flags: <defaults>
</compile_context>

<pallas_src>
import jax
import jax.numpy as jnp
from jax.experimental import pallas as pl
from jax.experimental.pallas import tpu as pltpu


def make_phy2raw(dilations, num_channels, kernel_size, batch, seq_len,
                 reverb_length, batch_tile=None):
    C, K, L, T, R = num_channels, kernel_size, len(dilations), seq_len, reverb_length
    Bt = batch if batch_tile is None else batch_tile
    assert batch % Bt == 0 and reverb_length <= seq_len
    n_tiles = batch // Bt          # v7x: batch_tile=batch//2 -> both TensorCores busy
    BT = Bt * T

    def kernel(x_ref, win_ref, wh_ref, wrm_ref, imp_ref, out_ref):
        xb = x_ref[0]                                           # (1, BT)
        ones = jnp.ones((1, BT), jnp.float32)
        # Per-segment time index: lanes hold Bt length-T signals back to back.
        pos = jax.lax.broadcasted_iota(jnp.int32, (1, BT), 1) % T

        # One VPU compare per *unique* shift value, reused everywhere (repeated
        # dilations and the reverb band share masks with the WaveNet layers).
        mask_cache = {}

        def seg_mask(s):
            if s not in mask_cache:
                mask_cache[s] = pos >= s
            return mask_cache[s]

        def causal_shift(v, s):
            # v[..., t] <- v[..., t - s] inside each length-T segment, 0 for t < s.
            if s == 0:
                return v
            return jnp.where(seg_mask(s), jnp.roll(v, s, axis=1), 0.0)

        # WaveNet input layer: 1x1 conv 1 -> C channels (VPU broadcast).
        cur = win_ref[:, 0:1] * xb + win_ref[:, 1:2]            # (C, BT)
        mix = jnp.zeros((1, BT), jnp.float32)
        for l, d in enumerate(dilations):
            xin = cur
            # Stack the K shifted tap inputs plus a ones (bias) row -> ONE matmul.
            taps = [causal_shift(xin, (K - 1 - tap) * d) for tap in range(K)]
            xs = jnp.concatenate(taps + [ones], axis=0)         # (K*C+1, BT)
            acc = jnp.dot(wh_ref[l], xs,
                          preferred_element_type=jnp.float32)   # (2C, BT)
            # Gated activation; sigmoid via tanh identity => one EUP op per element.
            gated = jnp.tanh(acc[:C]) * (0.5 + 0.5 * jnp.tanh(0.5 * acc[C:]))
            # Fused residual conv + linear_mix row (+ bias column) in one matmul.
            g_aug = jnp.concatenate([gated, ones], axis=0)      # (C+1, BT)
            w_l = wrm_ref[l]                                    # (C+1, C+1)
            if l + 1 < L:
                rm = jnp.dot(w_l, g_aug,
                             preferred_element_type=jnp.float32)    # (C+1, BT)
                mix = mix + rm[C:C + 1]                         # skip/mix contribution
                cur = rm[:C] + xin                              # residual update
            else:
                # Last layer: the residual output is never used -> mix row only.
                mix = mix + jnp.dot(w_l[C:C + 1], g_aug,
                                    preferred_element_type=jnp.float32)
        y = mix                                                 # (1, BT) WaveNet out
        # Reverb == causal conv with the length-R impulse: banded shift-accumulate.
        out = imp_ref[0] * y
        for r in range(1, R):
            out = out + imp_ref[r] * causal_shift(y, r)
        out_ref[0] = out

    in_specs = [
        pl.BlockSpec((1, 1, BT), lambda i: (i, 0, 0)),              # x batch tile
        pl.BlockSpec((C, 2), lambda i: (0, 0)),                     # [w_in | b_in]
        pl.BlockSpec((L, 2 * C, K * C + 1), lambda i: (0, 0, 0)),   # stacked taps + bh
        pl.BlockSpec((L, C + 1, C + 1), lambda i: (0, 0, 0)),       # [wr|br ; wm|bm]
        pl.BlockSpec(memory_space=pltpu.MemorySpace.SMEM),          # impulse band (R,)
    ]
    out_specs = pl.BlockSpec((1, 1, BT), lambda i: (i, 0, 0))

    call = pl.pallas_call(
        kernel,
        out_shape=jax.ShapeDtypeStruct((n_tiles, 1, BT), jnp.float32),
        grid=(n_tiles,),
        in_specs=in_specs,
        out_specs=out_specs,
        compiler_params=pltpu.CompilerParams(
            dimension_semantics=("parallel",)),
    )

    @jax.jit
    def fwd(x, w_in, b_in, wh, bh, wr, br, wm, bm, impulse_band):
        # Host-side weight re-layouts (tiny; traced once under jit).
        win = jnp.concatenate([w_in, b_in], axis=1)                       # (C, 2)
        wh_stack = jnp.transpose(wh, (0, 2, 1, 3)).reshape(L, 2 * C, K * C)
        wh_aug = jnp.concatenate([wh_stack, bh], axis=2)                  # (L,2C,K*C+1)
        # linear_mix bias is added exactly once -> fold it into layer 0's mix row.
        mix_bias = jnp.zeros((L, 1, 1), jnp.float32).at[0, 0, 0].set(bm[0, 0])
        wrm_aug = jnp.concatenate(
            [jnp.concatenate([wr, br], axis=2),                           # (L, C, C+1)
             jnp.concatenate([wm, mix_bias], axis=2)], axis=1)            # (L,C+1,C+1)
        xt = x.reshape(n_tiles, 1, BT)
        out = call(xt, win, wh_aug, wrm_aug, impulse_band)
        return out.reshape(batch, T)

    return fwd


# ---------- plain-JAX glue: Reverb impulse + Toeplitz (reference only) -------------
def build_impulse(noise, decay, wet, length, sampling_rate, seq_len):
    # Mirrors Reverb.build_impulse() + zero-pad to the signal length.
    t = jnp.arange(length, dtype=jnp.float32) / sampling_rate
    env = jnp.exp(-jax.nn.softplus(-decay) * t * 500.0)
    imp = noise[:, 0] * env * jax.nn.sigmoid(wet)
    imp = imp.at[0].set(1.0)
    return jnp.pad(imp, (0, seq_len - length))


def build_toeplitz(impulse):
    # toep[m, j] = impulse[j - m] for j >= m ; equals the rfft/irfft reverb.
    T = impulse.shape[0]
    m = jnp.arange(T)[:, None]
    j = jnp.arange(T)[None, :]
    diff = j - m
    return jnp.where(diff >= 0, impulse[jnp.clip(diff, 0, T - 1)],
                     0.0).astype(jnp.float32)


def _causal_shift_ref(v, s):
    if s == 0:
        return v
    t = v.shape[-1]
    if s >= t:
        return jnp.zeros_like(v)
    zeros = jnp.zeros(v.shape[:-1] + (s,), v.dtype)
    return jnp.concatenate([zeros, v[..., : t - s]], axis=-1)


# ---------- pure-JAX reference (same math, batched) --------------------------------
def phy2raw_reference(x, w_in, b_in, wh, bh, wr, br, wm, bm, toep, dilations, C, K):
    B, T = x.shape
    cur = w_in[None, :, 0, None] * x[:, None, :] + b_in[None, :, 0, None]
    mix = jnp.zeros((B, T), jnp.float32)
    for l, d in enumerate(dilations):
        xin = cur
        acc = jnp.zeros((B, 2 * C, T), jnp.float32) + bh[l][None]
        for tap in range(K):
            s = (K - 1 - tap) * d
            xs = _causal_shift_ref(xin, s)
            acc = acc + jnp.einsum('oc,bct->bot', wh[l, tap], xs)
        gated = jnp.tanh(acc[:, :C]) * jax.nn.sigmoid(acc[:, C:])
        mix = mix + jnp.einsum('oc,bct->bot', wm[l], gated)[:, 0, :]
        cur = jnp.einsum('oc,bct->bot', wr[l], gated) + br[l][None] + xin
    y = mix + bm[0, 0]
    return y @ toep


if __name__ == "__main__":
    # Small, module-consistent shapes.
    B, T = 2, 128                       # batch, signal length
    C, DILATION_DEPTH, REPEAT, K = 4, 2, 2, 3
    SAMPLING_RATE = 16000
    REVERB_LEN = 32
    assert REVERB_LEN <= T
    dilations = [2 ** d for d in range(DILATION_DEPTH)] * REPEAT
    L = len(dilations)

    key = jax.random.PRNGKey(0)
    ks = jax.random.split(key, 11)
    # Deterministic synthetic parameters (shapes follow the nn.Module __init__).
    w_in = 0.5 * jax.random.normal(ks[0], (C, 1), jnp.float32)
    b_in = 0.1 * jax.random.normal(ks[1], (C, 1), jnp.float32)
    wh = 0.3 * jax.random.normal(ks[2], (L, K, 2 * C, C), jnp.float32)
    bh = 0.1 * jax.random.normal(ks[3], (L, 2 * C, 1), jnp.float32)
    wr = 0.3 * jax.random.normal(ks[4], (L, C, C), jnp.float32)
    br = 0.1 * jax.random.normal(ks[5], (L, C, 1), jnp.float32)
    wm = 0.3 * jax.random.normal(ks[6], (L, 1, C), jnp.float32)
    bm = 0.1 * jax.random.normal(ks[7], (1, 1), jnp.float32)
    reverb_noise = jax.random.uniform(ks[8], (REVERB_LEN, 1), jnp.float32) * 2.0 - 1.0
    reverb_decay = jnp.float32(5.0)     # initial_decay
    reverb_wet = jnp.float32(0.0)       # initial_wet

    x = jax.random.normal(ks[9], (B, T), jnp.float32)

    impulse = build_impulse(reverb_noise, reverb_decay, reverb_wet,
                            REVERB_LEN, SAMPLING_RATE, T)
    impulse_band = impulse[:REVERB_LEN]     # only the nonzero band goes to the kernel
    toep = build_toeplitz(impulse)          # reference path only

    # Full batch fold -> single grid step (on v7x use batch_tile=B//2 for 2 TCs).
    fwd = make_phy2raw(dilations, C, K, B, T, REVERB_LEN)
    out = fwd(x, w_in, b_in, wh, bh, wr, br, wm, bm, impulse_band)
    out = jax.block_until_ready(out)

    ref = phy2raw_reference(x, w_in, b_in, wh, bh, wr, br, wm, bm, toep,
                            dilations, C, K)
    assert out.shape == (B, T)
    if not bool(jnp.all(jnp.isfinite(out))):
        raise RuntimeError("non-finite output")
    if not bool(jnp.allclose(out, ref, rtol=2e-2, atol=2e-2)):
        err = float(jnp.max(jnp.abs(out - ref)))
        raise RuntimeError(f"kernel/reference mismatch, max abs err = {err}")
    print("KERNEL_OK")
</pallas_src>

<mosaic_0001>
module attributes {stable_mosaic.version = 11 : i64} {
  func.func @kernel(%arg0: i32, %arg1: memref<1x1x256xf32, #tpu.memory_space<vmem>>, %arg2: memref<4x2xf32, #tpu.memory_space<vmem>>, %arg3: memref<4x8x13xf32, #tpu.memory_space<vmem>>, %arg4: memref<4x5x5xf32, #tpu.memory_space<vmem>>, %arg5: memref<32xf32, #tpu.memory_space<smem>>, %arg6: memref<1x1x256xf32, #tpu.memory_space<vmem>>) attributes {dimension_semantics = [#tpu.dimension_semantics<parallel>], iteration_bounds = array<i64: 1>, scalar_prefetch = 0 : i64, scratch_operands = 0 : i64, tpu.core_type = #tpu.core_type<tc>, window_params = [{transform_indices = @transform_0, window_bounds = array<i64: 1, 1, 256>}, {pipeline_mode = #tpu.pipeline_mode<synchronous>, transform_indices = @transform_1, window_bounds = array<i64: 4, 2>}, {pipeline_mode = #tpu.pipeline_mode<synchronous>, transform_indices = @transform_2, window_bounds = array<i64: 4, 8, 13>}, {pipeline_mode = #tpu.pipeline_mode<synchronous>, transform_indices = @transform_3, window_bounds = array<i64: 4, 5, 5>}, {transform_indices = @transform_4, window_bounds = array<i64: 32>}, {transform_indices = @transform_5, window_bounds = array<i64: 1, 1, 256>}]} {
    %c0 = arith.constant 0 : index
    %c0_0 = arith.constant 0 : index
    %c0_1 = arith.constant 0 : index
    %0 = vector.load %arg1[%c0, %c0_0, %c0_1] : memref<1x1x256xf32, #tpu.memory_space<vmem>>, vector<1x1x256xf32>
    %1 = vector.shape_cast %0 : vector<1x1x256xf32> to vector<1x256xf32>
    %cst = arith.constant 1.000000e+00 : f32
    %2 = vector.broadcast %cst : f32 to vector<1x256xf32>
    %3 = tpu.iota {dimensions = array<i32: 1>} : vector<1x256xi32>
    %c128_i32 = arith.constant 128 : i32
    %c0_i32 = arith.constant 0 : i32
    %4 = arith.cmpi eq, %c128_i32, %c0_i32 : i32
    %c1_i32 = arith.constant 1 : i32
    %5 = arith.select %4, %c1_i32, %c128_i32 : i32
    %6 = vector.broadcast %5 : i32 to vector<1x256xi32>
    %7 = arith.remsi %3, %6 : vector<1x256xi32>
    %c0_i32_2 = arith.constant 0 : i32
    %8 = vector.broadcast %c0_i32_2 : i32 to vector<1x256xi32>
    %9 = arith.cmpi ne, %7, %8 : vector<1x256xi32>
    %c0_i32_3 = arith.constant 0 : i32
    %10 = vector.broadcast %c0_i32_3 : i32 to vector<1x256xi32>
    %11 = arith.cmpi slt, %7, %10 : vector<1x256xi32>
    %c0_i32_4 = arith.constant 0 : i32
    %12 = arith.cmpi slt, %5, %c0_i32_4 : i32
    %13 = vector.broadcast %12 : i1 to vector<1x256xi1>
    %14 = vector.broadcast %13 : vector<1x256xi1> to vector<1x256xi1>
    %15 = arith.xori %11, %14 : vector<1x256xi1>
    %16 = arith.andi %15, %9 : vector<1x256xi1>
    %17 = vector.broadcast %5 : i32 to vector<1x256xi32>
    %18 = arith.addi %7, %17 : vector<1x256xi32>
    %19 = arith.select %16, %18, %7 : vector<1x256xi1>, vector<1x256xi32>
    %c0_5 = arith.constant 0 : index
    %c0_6 = arith.constant 0 : index
    %20 = vector.load %arg2[%c0_5, %c0_6] : memref<4x2xf32, #tpu.memory_space<vmem>>, vector<4x1xf32>
    %21 = vector.broadcast %20 : vector<4x1xf32> to vector<4x256xf32>
    %22 = vector.broadcast %1 : vector<1x256xf32> to vector<4x256xf32>
    %23 = arith.mulf %21, %22 : vector<4x256xf32>
    %c0_7 = arith.constant 0 : index
    %c1 = arith.constant 1 : index
    %24 = vector.load %arg2[%c0_7, %c1] : memref<4x2xf32, #tpu.memory_space<vmem>>, vector<4x1xf32>
    %25 = vector.broadcast %24 : vector<4x1xf32> to vector<4x256xf32>
    %26 = arith.addf %23, %25 : vector<4x256xf32>
    %cst_8 = arith.constant 0.000000e+00 : f32
    %27 = vector.broadcast %cst_8 : f32 to vector<1x256xf32>
    %c2_i32 = arith.constant 2 : i32
    %28 = vector.broadcast %c2_i32 : i32 to vector<1x256xi32>
    %29 = arith.cmpi sge, %19, %28 : vector<1x256xi32>
    %30 = vector.extract_strided_slice %26 {offsets = [0, 254], sizes = [4, 2], strides = [1, 1]} : vector<4x256xf32> to vector<4x2xf32>
    %31 = vector.extract_strided_slice %26 {offsets = [0, 0], sizes = [4, 254], strides = [1, 1]} : vector<4x256xf32> to vector<4x254xf32>
    %32 = tpu.concatenate %30, %31 in 1 : vector<4x2xf32>, vector<4x254xf32> -> vector<4x256xf32>
    %cst_9 = arith.constant 0.000000e+00 : f32
    %33 = vector.shape_cast %29 : vector<1x256xi1> to vector<1x256xi1>
    %34 = vector.broadcast %33 : vector<1x256xi1> to vector<4x256xi1>
    %35 = vector.broadcast %cst_9 : f32 to vector<4x256xf32>
    %36 = arith.select %34, %32, %35 : vector<4x256xi1>, vector<4x256xf32>
    %c1_i32_10 = arith.constant 1 : i32
    %37 = vector.broadcast %c1_i32_10 : i32 to vector<1x256xi32>
    %38 = arith.cmpi sge, %19, %37 : vector<1x256xi32>
    %39 = vector.extract_strided_slice %26 {offsets = [0, 255], sizes = [4, 1], strides = [1, 1]} : vector<4x256xf32> to vector<4x1xf32>
    %40 = vector.extract_strided_slice %26 {offsets = [0, 0], sizes = [4, 255], strides = [1, 1]} : vector<4x256xf32> to vector<4x255xf32>
    %41 = tpu.concatenate %39, %40 in 1 : vector<4x1xf32>, vector<4x255xf32> -> vector<4x256xf32>
    %cst_11 = arith.constant 0.000000e+00 : f32
    %42 = vector.shape_cast %38 : vector<1x256xi1> to vector<1x256xi1>
    %43 = vector.broadcast %42 : vector<1x256xi1> to vector<4x256xi1>
    %44 = vector.broadcast %cst_11 : f32 to vector<4x256xf32>
    %45 = arith.select %43, %41, %44 : vector<4x256xi1>, vector<4x256xf32>
    %46 = tpu.concatenate %36, %45, %26, %2 in 0 : vector<4x256xf32>, vector<4x256xf32>, vector<4x256xf32>, vector<1x256xf32> -> vector<13x256xf32>
    %c0_12 = arith.constant 0 : index
    %c0_13 = arith.constant 0 : index
    %c0_14 = arith.constant 0 : index
    %47 = vector.load %arg3[%c0_12, %c0_13, %c0_14] : memref<4x8x13xf32, #tpu.memory_space<vmem>>, vector<1x8x13xf32>
    %48 = vector.shape_cast %47 : vector<1x8x13xf32> to vector<8x13xf32>
    %cst_15 = arith.constant dense<0.000000e+00> : vector<8x256xf32>
    %49 = tpu.matmul %48, %46, %cst_15 {dimension_numbers = #tpu.dot_dimension_numbers<[1], [0], [0], [1], [0, 0, 1, 1], [], []>} : vector<8x13xf32>, vector<13x256xf32>, vector<8x256xf32> -> vector<8x256xf32>
    %50 = vector.extract_strided_slice %49 {offsets = [0, 0], sizes = [4, 256], strides = [1, 1]} : vector<8x256xf32> to vector<4x256xf32>
    %51 = math.tanh %50 : vector<4x256xf32>
    %52 = vector.extract_strided_slice %49 {offsets = [4, 0], sizes = [4, 256], strides = [1, 1]} : vector<8x256xf32> to vector<4x256xf32>
    %cst_16 = arith.constant 5.000000e-01 : f32
    %53 = vector.broadcast %cst_16 : f32 to vector<4x256xf32>
    %54 = arith.mulf %53, %52 : vector<4x256xf32>
    %55 = math.tanh %54 : vector<4x256xf32>
    %cst_17 = arith.constant 5.000000e-01 : f32
    %56 = vector.broadcast %cst_17 : f32 to vector<4x256xf32>
    %57 = arith.mulf %56, %55 : vector<4x256xf32>
    %cst_18 = arith.constant 5.000000e-01 : f32
    %58 = vector.broadcast %cst_18 : f32 to vector<4x256xf32>
    %59 = arith.addf %58, %57 : vector<4x256xf32>
    %60 = arith.mulf %51, %59 : vector<4x256xf32>
    %61 = tpu.concatenate %60, %2 in 0 : vector<4x256xf32>, vector<1x256xf32> -> vector<5x256xf32>
    %c0_19 = arith.constant 0 : index
    %c0_20 = arith.constant 0 : index
    %c0_21 = arith.constant 0 : index
    %62 = vector.load %arg4[%c0_19, %c0_20, %c0_21] : memref<4x5x5xf32, #tpu.memory_space<vmem>>, vector<1x5x5xf32>
    %63 = vector.shape_cast %62 : vector<1x5x5xf32> to vector<5x5xf32>
    %cst_22 = arith.constant dense<0.000000e+00> : vector<5x256xf32>
    %64 = tpu.matmul %63, %61, %cst_22 {dimension_numbers = #tpu.dot_dimension_numbers<[1], [0], [0], [1], [0, 0, 1, 1], [], []>} : vector<5x5xf32>, vector<5x256xf32>, vector<5x256xf32> -> vector<5x256xf32>
    %65 = vector.extract_strided_slice %64 {offsets = [4, 0], sizes = [1, 256], strides = [1, 1]} : vector<5x256xf32> to vector<1x256xf32>
    %66 = arith.addf %27, %65 : vector<1x256xf32>
    %67 = vector.extract_strided_slice %64 {offsets = [0, 0], sizes = [4, 256], strides = [1, 1]} : vector<5x256xf32> to vector<4x256xf32>
    %68 = arith.addf %67, %26 : vector<4x256xf32>
    %c4_i32 = arith.constant 4 : i32
    %69 = vector.broadcast %c4_i32 : i32 to vector<1x256xi32>
    %70 = arith.cmpi sge, %19, %69 : vector<1x256xi32>
    %71 = vector.extract_strided_slice %68 {offsets = [0, 252], sizes = [4, 4], strides = [1, 1]} : vector<4x256xf32> to vector<4x4xf32>
    %72 = vector.extract_strided_slice %68 {offsets = [0, 0], sizes = [4, 252], strides = [1, 1]} : vector<4x256xf32> to vector<4x252xf32>
    %73 = tpu.concatenate %71, %72 in 1 : vector<4x4xf32>, vector<4x252xf32> -> vector<4x256xf32>
    %cst_23 = arith.constant 0.000000e+00 : f32
    %74 = vector.shape_cast %70 : vector<1x256xi1> to vector<1x256xi1>
    %75 = vector.broadcast %74 : vector<1x256xi1> to vector<4x256xi1>
    %76 = vector.broadcast %cst_23 : f32 to vector<4x256xf32>
    %77 = arith.select %75, %73, %76 : vector<4x256xi1>, vector<4x256xf32>
    %78 = vector.extract_strided_slice %68 {offsets = [0, 254], sizes = [4, 2], strides = [1, 1]} : vector<4x256xf32> to vector<4x2xf32>
    %79 = vector.extract_strided_slice %68 {offsets = [0, 0], sizes = [4, 254], strides = [1, 1]} : vector<4x256xf32> to vector<4x254xf32>
    %80 = tpu.concatenate %78, %79 in 1 : vector<4x2xf32>, vector<4x254xf32> -> vector<4x256xf32>
    %cst_24 = arith.constant 0.000000e+00 : f32
    %81 = vector.shape_cast %29 : vector<1x256xi1> to vector<1x256xi1>
    %82 = vector.broadcast %81 : vector<1x256xi1> to vector<4x256xi1>
    %83 = vector.broadcast %cst_24 : f32 to vector<4x256xf32>
    %84 = arith.select %82, %80, %83 : vector<4x256xi1>, vector<4x256xf32>
    %85 = tpu.concatenate %77, %84, %68, %2 in 0 : vector<4x256xf32>, vector<4x256xf32>, vector<4x256xf32>, vector<1x256xf32> -> vector<13x256xf32>
    %c1_25 = arith.constant 1 : index
    %c0_26 = arith.constant 0 : index
    %c0_27 = arith.constant 0 : index
    %86 = vector.load %arg3[%c1_25, %c0_26, %c0_27] : memref<4x8x13xf32, #tpu.memory_space<vmem>>, vector<1x8x13xf32>
    %87 = vector.shape_cast %86 : vector<1x8x13xf32> to vector<8x13xf32>
    %cst_28 = arith.constant dense<0.000000e+00> : vector<8x256xf32>
    %88 = tpu.matmul %87, %85, %cst_28 {dimension_numbers = #tpu.dot_dimension_numbers<[1], [0], [0], [1], [0, 0, 1, 1], [], []>} : vector<8x13xf32>, vector<13x256xf32>, vector<8x256xf32> -> vector<8x256xf32>
    %89 = vector.extract_strided_slice %88 {offsets = [0, 0], sizes = [4, 256], strides = [1, 1]} : vector<8x256xf32> to vector<4x256xf32>
    %90 = math.tanh %89 : vector<4x256xf32>
    %91 = vector.extract_strided_slice %88 {offsets = [4, 0], sizes = [4, 256], strides = [1, 1]} : vector<8x256xf32> to vector<4x256xf32>
    %cst_29 = arith.constant 5.000000e-01 : f32
    %92 = vector.broadcast %cst_29 : f32 to vector<4x256xf32>
    %93 = arith.mulf %92, %91 : vector<4x256xf32>
    %94 = math.tanh %93 : vector<4x256xf32>
    %cst_30 = arith.constant 5.000000e-01 : f32
    %95 = vector.broadcast %cst_30 : f32 to vector<4x256xf32>
    %96 = arith.mulf %95, %94 : vector<4x256xf32>
    %cst_31 = arith.constant 5.000000e-01 : f32
    %97 = vector.broadcast %cst_31 : f32 to vector<4x256xf32>
    %98 = arith.addf %97, %96 : vector<4x256xf32>
    %99 = arith.mulf %90, %98 : vector<4x256xf32>
    %100 = tpu.concatenate %99, %2 in 0 : vector<4x256xf32>, vector<1x256xf32> -> vector<5x256xf32>
    %c1_32 = arith.constant 1 : index
    %c0_33 = arith.constant 0 : index
    %c0_34 = arith.constant 0 : index
    %101 = vector.load %arg4[%c1_32, %c0_33, %c0_34] : memref<4x5x5xf32, #tpu.memory_space<vmem>>, vector<1x5x5xf32>
    %102 = vector.shape_cast %101 : vector<1x5x5xf32> to vector<5x5xf32>
    %cst_35 = arith.constant dense<0.000000e+00> : vector<5x256xf32>
    %103 = tpu.matmul %102, %100, %cst_35 {dimension_numbers = #tpu.dot_dimension_numbers<[1], [0], [0], [1], [0, 0, 1, 1], [], []>} : vector<5x5xf32>, vector<5x256xf32>, vector<5x256xf32> -> vector<5x256xf32>
    %104 = vector.extract_strided_slice %103 {offsets = [4, 0], sizes = [1, 256], strides = [1, 1]} : vector<5x256xf32> to vector<1x256xf32>
    %105 = arith.addf %66, %104 : vector<1x256xf32>
    %106 = vector.extract_strided_slice %103 {offsets = [0, 0], sizes = [4, 256], strides = [1, 1]} : vector<5x256xf32> to vector<4x256xf32>
    %107 = arith.addf %106, %68 : vector<4x256xf32>
    %108 = vector.extract_strided_slice %107 {offsets = [0, 254], sizes = [4, 2], strides = [1, 1]} : vector<4x256xf32> to vector<4x2xf32>
    %109 = vector.extract_strided_slice %107 {offsets = [0, 0], sizes = [4, 254], strides = [1, 1]} : vector<4x256xf32> to vector<4x254xf32>
    %110 = tpu.concatenate %108, %109 in 1 : vector<4x2xf32>, vector<4x254xf32> -> vector<4x256xf32>
    %cst_36 = arith.constant 0.000000e+00 : f32
    %111 = vector.shape_cast %29 : vector<1x256xi1> to vector<1x256xi1>
    %112 = vector.broadcast %111 : vector<1x256xi1> to vector<4x256xi1>
    %113 = vector.broadcast %cst_36 : f32 to vector<4x256xf32>
    %114 = arith.select %112, %110, %113 : vector<4x256xi1>, vector<4x256xf32>
    %115 = vector.extract_strided_slice %107 {offsets = [0, 255], sizes = [4, 1], strides = [1, 1]} : vector<4x256xf32> to vector<4x1xf32>
    %116 = vector.extract_strided_slice %107 {offsets = [0, 0], sizes = [4, 255], strides = [1, 1]} : vector<4x256xf32> to vector<4x255xf32>
    %117 = tpu.concatenate %115, %116 in 1 : vector<4x1xf32>, vector<4x255xf32> -> vector<4x256xf32>
    %cst_37 = arith.constant 0.000000e+00 : f32
    %118 = vector.shape_cast %38 : vector<1x256xi1> to vector<1x256xi1>
    %119 = vector.broadcast %118 : vector<1x256xi1> to vector<4x256xi1>
    %120 = vector.broadcast %cst_37 : f32 to vector<4x256xf32>
    %121 = arith.select %119, %117, %120 : vector<4x256xi1>, vector<4x256xf32>
    %122 = tpu.concatenate %114, %121, %107, %2 in 0 : vector<4x256xf32>, vector<4x256xf32>, vector<4x256xf32>, vector<1x256xf32> -> vector<13x256xf32>
    %c2 = arith.constant 2 : index
    %c0_38 = arith.constant 0 : index
    %c0_39 = arith.constant 0 : index
    %123 = vector.load %arg3[%c2, %c0_38, %c0_39] : memref<4x8x13xf32, #tpu.memory_space<vmem>>, vector<1x8x13xf32>
    %124 = vector.shape_cast %123 : vector<1x8x13xf32> to vector<8x13xf32>
    %cst_40 = arith.constant dense<0.000000e+00> : vector<8x256xf32>
    %125 = tpu.matmul %124, %122, %cst_40 {dimension_numbers = #tpu.dot_dimension_numbers<[1], [0], [0], [1], [0, 0, 1, 1], [], []>} : vector<8x13xf32>, vector<13x256xf32>, vector<8x256xf32> -> vector<8x256xf32>
    %126 = vector.extract_strided_slice %125 {offsets = [0, 0], sizes = [4, 256], strides = [1, 1]} : vector<8x256xf32> to vector<4x256xf32>
    %127 = math.tanh %126 : vector<4x256xf32>
    %128 = vector.extract_strided_slice %125 {offsets = [4, 0], sizes = [4, 256], strides = [1, 1]} : vector<8x256xf32> to vector<4x256xf32>
    %cst_41 = arith.constant 5.000000e-01 : f32
    %129 = vector.broadcast %cst_41 : f32 to vector<4x256xf32>
    %130 = arith.mulf %129, %128 : vector<4x256xf32>
    %131 = math.tanh %130 : vector<4x256xf32>
    %cst_42 = arith.constant 5.000000e-01 : f32
    %132 = vector.broadcast %cst_42 : f32 to vector<4x256xf32>
    %133 = arith.mulf %132, %131 : vector<4x256xf32>
    %cst_43 = arith.constant 5.000000e-01 : f32
    %134 = vector.broadcast %cst_43 : f32 to vector<4x256xf32>
    %135 = arith.addf %134, %133 : vector<4x256xf32>
    %136 = arith.mulf %127, %135 : vector<4x256xf32>
    %137 = tpu.concatenate %136, %2 in 0 : vector<4x256xf32>, vector<1x256xf32> -> vector<5x256xf32>
    %c2_44 = arith.constant 2 : index
    %c0_45 = arith.constant 0 : index
    %c0_46 = arith.constant 0 : index
    %138 = vector.load %arg4[%c2_44, %c0_45, %c0_46] : memref<4x5x5xf32, #tpu.memory_space<vmem>>, vector<1x5x5xf32>
    %139 = vector.shape_cast %138 : vector<1x5x5xf32> to vector<5x5xf32>
    %cst_47 = arith.constant dense<0.000000e+00> : vector<5x256xf32>
    %140 = tpu.matmul %139, %137, %cst_47 {dimension_numbers = #tpu.dot_dimension_numbers<[1], [0], [0], [1], [0, 0, 1, 1], [], []>} : vector<5x5xf32>, vector<5x256xf32>, vector<5x256xf32> -> vector<5x256xf32>
    %141 = vector.extract_strided_slice %140 {offsets = [4, 0], sizes = [1, 256], strides = [1, 1]} : vector<5x256xf32> to vector<1x256xf32>
    %142 = arith.addf %105, %141 : vector<1x256xf32>
    %143 = vector.extract_strided_slice %140 {offsets = [0, 0], sizes = [4, 256], strides = [1, 1]} : vector<5x256xf32> to vector<4x256xf32>
    %144 = arith.addf %143, %107 : vector<4x256xf32>
    %145 = vector.extract_strided_slice %144 {offsets = [0, 252], sizes = [4, 4], strides = [1, 1]} : vector<4x256xf32> to vector<4x4xf32>
    %146 = vector.extract_strided_slice %144 {offsets = [0, 0], sizes = [4, 252], strides = [1, 1]} : vector<4x256xf32> to vector<4x252xf32>
    %147 = tpu.concatenate %145, %146 in 1 : vector<4x4xf32>, vector<4x252xf32> -> vector<4x256xf32>
    %cst_48 = arith.constant 0.000000e+00 : f32
    %148 = vector.shape_cast %70 : vector<1x256xi1> to vector<1x256xi1>
    %149 = vector.broadcast %148 : vector<1x256xi1> to vector<4x256xi1>
    %150 = vector.broadcast %cst_48 : f32 to vector<4x256xf32>
    %151 = arith.select %149, %147, %150 : vector<4x256xi1>, vector<4x256xf32>
    %152 = vector.extract_strided_slice %144 {offsets = [0, 254], sizes = [4, 2], strides = [1, 1]} : vector<4x256xf32> to vector<4x2xf32>
    %153 = vector.extract_strided_slice %144 {offsets = [0, 0], sizes = [4, 254], strides = [1, 1]} : vector<4x256xf32> to vector<4x254xf32>
    %154 = tpu.concatenate %152, %153 in 1 : vector<4x2xf32>, vector<4x254xf32> -> vector<4x256xf32>
    %cst_49 = arith.constant 0.000000e+00 : f32
    %155 = vector.shape_cast %29 : vector<1x256xi1> to vector<1x256xi1>
    %156 = vector.broadcast %155 : vector<1x256xi1> to vector<4x256xi1>
    %157 = vector.broadcast %cst_49 : f32 to vector<4x256xf32>
    %158 = arith.select %156, %154, %157 : vector<4x256xi1>, vector<4x256xf32>
    %159 = tpu.concatenate %151, %158, %144, %2 in 0 : vector<4x256xf32>, vector<4x256xf32>, vector<4x256xf32>, vector<1x256xf32> -> vector<13x256xf32>
    %c3 = arith.constant 3 : index
    %c0_50 = arith.constant 0 : index
    %c0_51 = arith.constant 0 : index
    %160 = vector.load %arg3[%c3, %c0_50, %c0_51] : memref<4x8x13xf32, #tpu.memory_space<vmem>>, vector<1x8x13xf32>
    %161 = vector.shape_cast %160 : vector<1x8x13xf32> to vector<8x13xf32>
    %cst_52 = arith.constant dense<0.000000e+00> : vector<8x256xf32>
    %162 = tpu.matmul %161, %159, %cst_52 {dimension_numbers = #tpu.dot_dimension_numbers<[1], [0], [0], [1], [0, 0, 1, 1], [], []>} : vector<8x13xf32>, vector<13x256xf32>, vector<8x256xf32> -> vector<8x256xf32>
    %163 = vector.extract_strided_slice %162 {offsets = [0, 0], sizes = [4, 256], strides = [1, 1]} : vector<8x256xf32> to vector<4x256xf32>
    %164 = math.tanh %163 : vector<4x256xf32>
    %165 = vector.extract_strided_slice %162 {offsets = [4, 0], sizes = [4, 256], strides = [1, 1]} : vector<8x256xf32> to vector<4x256xf32>
    %cst_53 = arith.constant 5.000000e-01 : f32
    %166 = vector.broadcast %cst_53 : f32 to vector<4x256xf32>
    %167 = arith.mulf %166, %165 : vector<4x256xf32>
    %168 = math.tanh %167 : vector<4x256xf32>
    %cst_54 = arith.constant 5.000000e-01 : f32
    %169 = vector.broadcast %cst_54 : f32 to vector<4x256xf32>
    %170 = arith.mulf %169, %168 : vector<4x256xf32>
    %cst_55 = arith.constant 5.000000e-01 : f32
    %171 = vector.broadcast %cst_55 : f32 to vector<4x256xf32>
    %172 = arith.addf %171, %170 : vector<4x256xf32>
    %173 = arith.mulf %164, %172 : vector<4x256xf32>
    %174 = tpu.concatenate %173, %2 in 0 : vector<4x256xf32>, vector<1x256xf32> -> vector<5x256xf32>
    %c3_56 = arith.constant 3 : index
    %c0_57 = arith.constant 0 : index
    %c0_58 = arith.constant 0 : index
    %175 = vector.load %arg4[%c3_56, %c0_57, %c0_58] : memref<4x5x5xf32, #tpu.memory_space<vmem>>, vector<1x5x5xf32>
    %176 = vector.shape_cast %175 : vector<1x5x5xf32> to vector<5x5xf32>
    %177 = vector.extract_strided_slice %176 {offsets = [4, 0], sizes = [1, 5], strides = [1, 1]} : vector<5x5xf32> to vector<1x5xf32>
    %cst_59 = arith.constant dense<0.000000e+00> : vector<1x256xf32>
    %178 = tpu.matmul %177, %174, %cst_59 {dimension_numbers = #tpu.dot_dimension_numbers<[1], [0], [0], [1], [0, 0, 1, 1], [], []>} : vector<1x5xf32>, vector<5x256xf32>, vector<1x256xf32> -> vector<1x256xf32>
    %179 = arith.addf %142, %178 : vector<1x256xf32>
    %c0_60 = arith.constant 0 : index
    %180 = memref.load %arg5[%c0_60] : memref<32xf32, #tpu.memory_space<smem>>
    %181 = vector.broadcast %180 : f32 to vector<1x256xf32>
    %182 = arith.mulf %181, %179 : vector<1x256xf32>
    %c1_61 = arith.constant 1 : index
    %183 = memref.load %arg5[%c1_61] : memref<32xf32, #tpu.memory_space<smem>>
    %184 = vector.extract_strided_slice %179 {offsets = [0, 255], sizes = [1, 1], strides = [1, 1]} : vector<1x256xf32> to vector<1x1xf32>
    %185 = vector.extract_strided_slice %179 {offsets = [0, 0], sizes = [1, 255], strides = [1, 1]} : vector<1x256xf32> to vector<1x255xf32>
    %186 = tpu.concatenate %184, %185 in 1 : vector<1x1xf32>, vector<1x255xf32> -> vector<1x256xf32>
    %cst_62 = arith.constant 0.000000e+00 : f32
    %187 = vector.broadcast %cst_62 : f32 to vector<1x256xf32>
    %188 = arith.select %38, %186, %187 : vector<1x256xi1>, vector<1x256xf32>
    %189 = vector.broadcast %183 : f32 to vector<1x256xf32>
    %190 = arith.mulf %189, %188 : vector<1x256xf32>
    %191 = arith.addf %182, %190 : vector<1x256xf32>
    %c2_63 = arith.constant 2 : index
    %192 = memref.load %arg5[%c2_63] : memref<32xf32, #tpu.memory_space<smem>>
    %193 = vector.extract_strided_slice %179 {offsets = [0, 254], sizes = [1, 2], strides = [1, 1]} : vector<1x256xf32> to vector<1x2xf32>
    %194 = vector.extract_strided_slice %179 {offsets = [0, 0], sizes = [1, 254], strides = [1, 1]} : vector<1x256xf32> to vector<1x254xf32>
    %195 = tpu.concatenate %193, %194 in 1 : vector<1x2xf32>, vector<1x254xf32> -> vector<1x256xf32>
    %cst_64 = arith.constant 0.000000e+00 : f32
    %196 = vector.broadcast %cst_64 : f32 to vector<1x256xf32>
    %197 = arith.select %29, %195, %196 : vector<1x256xi1>, vector<1x256xf32>
    %198 = vector.broadcast %192 : f32 to vector<1x256xf32>
    %199 = arith.mulf %198, %197 : vector<1x256xf32>
    %200 = arith.addf %191, %199 : vector<1x256xf32>
    %c3_65 = arith.constant 3 : index
    %201 = memref.load %arg5[%c3_65] : memref<32xf32, #tpu.memory_space<smem>>
    %c3_i32 = arith.constant 3 : i32
    %202 = vector.broadcast %c3_i32 : i32 to vector<1x256xi32>
    %203 = arith.cmpi sge, %19, %202 : vector<1x256xi32>
    %204 = vector.extract_strided_slice %179 {offsets = [0, 253], sizes = [1, 3], strides = [1, 1]} : vector<1x256xf32> to vector<1x3xf32>
    %205 = vector.extract_strided_slice %179 {offsets = [0, 0], sizes = [1, 253], strides = [1, 1]} : vector<1x256xf32> to vector<1x253xf32>
    %206 = tpu.concatenate %204, %205 in 1 : vector<1x3xf32>, vector<1x253xf32> -> vector<1x256xf32>
    %cst_66 = arith.constant 0.000000e+00 : f32
    %207 = vector.broadcast %cst_66 : f32 to vector<1x256xf32>
    %208 = arith.select %203, %206, %207 : vector<1x256xi1>, vector<1x256xf32>
    %209 = vector.broadcast %201 : f32 to vector<1x256xf32>
    %210 = arith.mulf %209, %208 : vector<1x256xf32>
    %211 = arith.addf %200, %210 : vector<1x256xf32>
    %c4 = arith.constant 4 : index
    %212 = memref.load %arg5[%c4] : memref<32xf32, #tpu.memory_space<smem>>
    %213 = vector.extract_strided_slice %179 {offsets = [0, 252], sizes = [1, 4], strides = [1, 1]} : vector<1x256xf32> to vector<1x4xf32>
    %214 = vector.extract_strided_slice %179 {offsets = [0, 0], sizes = [1, 252], strides = [1, 1]} : vector<1x256xf32> to vector<1x252xf32>
    %215 = tpu.concatenate %213, %214 in 1 : vector<1x4xf32>, vector<1x252xf32> -> vector<1x256xf32>
    %cst_67 = arith.constant 0.000000e+00 : f32
    %216 = vector.broadcast %cst_67 : f32 to vector<1x256xf32>
    %217 = arith.select %70, %215, %216 : vector<1x256xi1>, vector<1x256xf32>
    %218 = vector.broadcast %212 : f32 to vector<1x256xf32>
    %219 = arith.mulf %218, %217 : vector<1x256xf32>
    %220 = arith.addf %211, %219 : vector<1x256xf32>
    %c5 = arith.constant 5 : index
    %221 = memref.load %arg5[%c5] : memref<32xf32, #tpu.memory_space<smem>>
    %c5_i32 = arith.constant 5 : i32
    %222 = vector.broadcast %c5_i32 : i32 to vector<1x256xi32>
    %223 = arith.cmpi sge, %19, %222 : vector<1x256xi32>
    %224 = vector.extract_strided_slice %179 {offsets = [0, 251], sizes = [1, 5], strides = [1, 1]} : vector<1x256xf32> to vector<1x5xf32>
    %225 = vector.extract_strided_slice %179 {offsets = [0, 0], sizes = [1, 251], strides = [1, 1]} : vector<1x256xf32> to vector<1x251xf32>
    %226 = tpu.concatenate %224, %225 in 1 : vector<1x5xf32>, vector<1x251xf32> -> vector<1x256xf32>
    %cst_68 = arith.constant 0.000000e+00 : f32
    %227 = vector.broadcast %cst_68 : f32 to vector<1x256xf32>
    %228 = arith.select %223, %226, %227 : vector<1x256xi1>, vector<1x256xf32>
    %229 = vector.broadcast %221 : f32 to vector<1x256xf32>
    %230 = arith.mulf %229, %228 : vector<1x256xf32>
    %231 = arith.addf %220, %230 : vector<1x256xf32>
    %c6 = arith.constant 6 : index
    %232 = memref.load %arg5[%c6] : memref<32xf32, #tpu.memory_space<smem>>
    %c6_i32 = arith.constant 6 : i32
    %233 = vector.broadcast %c6_i32 : i32 to vector<1x256xi32>
    %234 = arith.cmpi sge, %19, %233 : vector<1x256xi32>
    %235 = vector.extract_strided_slice %179 {offsets = [0, 250], sizes = [1, 6], strides = [1, 1]} : vector<1x256xf32> to vector<1x6xf32>
    %236 = vector.extract_strided_slice %179 {offsets = [0, 0], sizes = [1, 250], strides = [1, 1]} : vector<1x256xf32> to vector<1x250xf32>
    %237 = tpu.concatenate %235, %236 in 1 : vector<1x6xf32>, vector<1x250xf32> -> vector<1x256xf32>
    %cst_69 = arith.constant 0.000000e+00 : f32
    %238 = vector.broadcast %cst_69 : f32 to vector<1x256xf32>
    %239 = arith.select %234, %237, %238 : vector<1x256xi1>, vector<1x256xf32>
    %240 = vector.broadcast %232 : f32 to vector<1x256xf32>
    %241 = arith.mulf %240, %239 : vector<1x256xf32>
    %242 = arith.addf %231, %241 : vector<1x256xf32>
    %c7 = arith.constant 7 : index
    %243 = memref.load %arg5[%c7] : memref<32xf32, #tpu.memory_space<smem>>
    %c7_i32 = arith.constant 7 : i32
    %244 = vector.broadcast %c7_i32 : i32 to vector<1x256xi32>
    %245 = arith.cmpi sge, %19, %244 : vector<1x256xi32>
    %246 = vector.extract_strided_slice %179 {offsets = [0, 249], sizes = [1, 7], strides = [1, 1]} : vector<1x256xf32> to vector<1x7xf32>
    %247 = vector.extract_strided_slice %179 {offsets = [0, 0], sizes = [1, 249], strides = [1, 1]} : vector<1x256xf32> to vector<1x249xf32>
    %248 = tpu.concatenate %246, %247 in 1 : vector<1x7xf32>, vector<1x249xf32> -> vector<1x256xf32>
    %cst_70 = arith.constant 0.000000e+00 : f32
    %249 = vector.broadcast %cst_70 : f32 to vector<1x256xf32>
    %250 = arith.select %245, %248, %249 : vector<1x256xi1>, vector<1x256xf32>
    %251 = vector.broadcast %243 : f32 to vector<1x256xf32>
    %252 = arith.mulf %251, %250 : vector<1x256xf32>
    %253 = arith.addf %242, %252 : vector<1x256xf32>
    %c8 = arith.constant 8 : index
    %254 = memref.load %arg5[%c8] : memref<32xf32, #tpu.memory_space<smem>>
    %c8_i32 = arith.constant 8 : i32
    %255 = vector.broadcast %c8_i32 : i32 to vector<1x256xi32>
    %256 = arith.cmpi sge, %19, %255 : vector<1x256xi32>
    %257 = vector.extract_strided_slice %179 {offsets = [0, 248], sizes = [1, 8], strides = [1, 1]} : vector<1x256xf32> to vector<1x8xf32>
    %258 = vector.extract_strided_slice %179 {offsets = [0, 0], sizes = [1, 248], strides = [1, 1]} : vector<1x256xf32> to vector<1x248xf32>
    %259 = tpu.concatenate %257, %258 in 1 : vector<1x8xf32>, vector<1x248xf32> -> vector<1x256xf32>
    %cst_71 = arith.constant 0.000000e+00 : f32
    %260 = vector.broadcast %cst_71 : f32 to vector<1x256xf32>
    %261 = arith.select %256, %259, %260 : vector<1x256xi1>, vector<1x256xf32>
    %262 = vector.broadcast %254 : f32 to vector<1x256xf32>
    %263 = arith.mulf %262, %261 : vector<1x256xf32>
    %264 = arith.addf %253, %263 : vector<1x256xf32>
    %c9 = arith.constant 9 : index
    %265 = memref.load %arg5[%c9] : memref<32xf32, #tpu.memory_space<smem>>
    %c9_i32 = arith.constant 9 : i32
    %266 = vector.broadcast %c9_i32 : i32 to vector<1x256xi32>
    %267 = arith.cmpi sge, %19, %266 : vector<1x256xi32>
    %268 = vector.extract_strided_slice %179 {offsets = [0, 247], sizes = [1, 9], strides = [1, 1]} : vector<1x256xf32> to vector<1x9xf32>
    %269 = vector.extract_strided_slice %179 {offsets = [0, 0], sizes = [1, 247], strides = [1, 1]} : vector<1x256xf32> to vector<1x247xf32>
    %270 = tpu.concatenate %268, %269 in 1 : vector<1x9xf32>, vector<1x247xf32> -> vector<1x256xf32>
    %cst_72 = arith.constant 0.000000e+00 : f32
    %271 = vector.broadcast %cst_72 : f32 to vector<1x256xf32>
    %272 = arith.select %267, %270, %271 : vector<1x256xi1>, vector<1x256xf32>
    %273 = vector.broadcast %265 : f32 to vector<1x256xf32>
    %274 = arith.mulf %273, %272 : vector<1x256xf32>
    %275 = arith.addf %264, %274 : vector<1x256xf32>
    %c10 = arith.constant 10 : index
    %276 = memref.load %arg5[%c10] : memref<32xf32, #tpu.memory_space<smem>>
    %c10_i32 = arith.constant 10 : i32
    %277 = vector.broadcast %c10_i32 : i32 to vector<1x256xi32>
    %278 = arith.cmpi sge, %19, %277 : vector<1x256xi32>
    %279 = vector.extract_strided_slice %179 {offsets = [0, 246], sizes = [1, 10], strides = [1, 1]} : vector<1x256xf32> to vector<1x10xf32>
    %280 = vector.extract_strided_slice %179 {offsets = [0, 0], sizes = [1, 246], strides = [1, 1]} : vector<1x256xf32> to vector<1x246xf32>
    %281 = tpu.concatenate %279, %280 in 1 : vector<1x10xf32>, vector<1x246xf32> -> vector<1x256xf32>
    %cst_73 = arith.constant 0.000000e+00 : f32
    %282 = vector.broadcast %cst_73 : f32 to vector<1x256xf32>
    %283 = arith.select %278, %281, %282 : vector<1x256xi1>, vector<1x256xf32>
    %284 = vector.broadcast %276 : f32 to vector<1x256xf32>
    %285 = arith.mulf %284, %283 : vector<1x256xf32>
    %286 = arith.addf %275, %285 : vector<1x256xf32>
    %c11 = arith.constant 11 : index
    %287 = memref.load %arg5[%c11] : memref<32xf32, #tpu.memory_space<smem>>
    %c11_i32 = arith.constant 11 : i32
    %288 = vector.broadcast %c11_i32 : i32 to vector<1x256xi32>
    %289 = arith.cmpi sge, %19, %288 : vector<1x256xi32>
    %290 = vector.extract_strided_slice %179 {offsets = [0, 245], sizes = [1, 11], strides = [1, 1]} : vector<1x256xf32> to vector<1x11xf32>
    %291 = vector.extract_strided_slice %179 {offsets = [0, 0], sizes = [1, 245], strides = [1, 1]} : vector<1x256xf32> to vector<1x245xf32>
    %292 = tpu.concatenate %290, %291 in 1 : vector<1x11xf32>, vector<1x245xf32> -> vector<1x256xf32>
    %cst_74 = arith.constant 0.000000e+00 : f32
    %293 = vector.broadcast %cst_74 : f32 to vector<1x256xf32>
    %294 = arith.select %289, %292, %293 : vector<1x256xi1>, vector<1x256xf32>
    %295 = vector.broadcast %287 : f32 to vector<1x256xf32>
    %296 = arith.mulf %295, %294 : vector<1x256xf32>
    %297 = arith.addf %286, %296 : vector<1x256xf32>
    %c12 = arith.constant 12 : index
    %298 = memref.load %arg5[%c12] : memref<32xf32, #tpu.memory_space<smem>>
    %c12_i32 = arith.constant 12 : i32
    %299 = vector.broadcast %c12_i32 : i32 to vector<1x256xi32>
    %300 = arith.cmpi sge, %19, %299 : vector<1x256xi32>
    %301 = vector.extract_strided_slice %179 {offsets = [0, 244], sizes = [1, 12], strides = [1, 1]} : vector<1x256xf32> to vector<1x12xf32>
    %302 = vector.extract_strided_slice %179 {offsets = [0, 0], sizes = [1, 244], strides = [1, 1]} : vector<1x256xf32> to vector<1x244xf32>
    %303 = tpu.concatenate %301, %302 in 1 : vector<1x12xf32>, vector<1x244xf32> -> vector<1x256xf32>
    %cst_75 = arith.constant 0.000000e+00 : f32
    %304 = vector.broadcast %cst_75 : f32 to vector<1x256xf32>
    %305 = arith.select %300, %303, %304 : vector<1x256xi1>, vector<1x256xf32>
    %306 = vector.broadcast %298 : f32 to vector<1x256xf32>
    %307 = arith.mulf %306, %305 : vector<1x256xf32>
    %308 = arith.addf %297, %307 : vector<1x256xf32>
    %c13 = arith.constant 13 : index
    %309 = memref.load %arg5[%c13] : memref<32xf32, #tpu.memory_space<smem>>
    %c13_i32 = arith.constant 13 : i32
    %310 = vector.broadcast %c13_i32 : i32 to vector<1x256xi32>
    %311 = arith.cmpi sge, %19, %310 : vector<1x256xi32>
    %312 = vector.extract_strided_slice %179 {offsets = [0, 243], sizes = [1, 13], strides = [1, 1]} : vector<1x256xf32> to vector<1x13xf32>
    %313 = vector.extract_strided_slice %179 {offsets = [0, 0], sizes = [1, 243], strides = [1, 1]} : vector<1x256xf32> to vector<1x243xf32>
    %314 = tpu.concatenate %312, %313 in 1 : vector<1x13xf32>, vector<1x243xf32> -> vector<1x256xf32>
    %cst_76 = arith.constant 0.000000e+00 : f32
    %315 = vector.broadcast %cst_76 : f32 to vector<1x256xf32>
    %316 = arith.select %311, %314, %315 : vector<1x256xi1>, vector<1x256xf32>
    %317 = vector.broadcast %309 : f32 to vector<1x256xf32>
    %318 = arith.mulf %317, %316 : vector<1x256xf32>
    %319 = arith.addf %308, %318 : vector<1x256xf32>
    %c14 = arith.constant 14 : index
    %320 = memref.load %arg5[%c14] : memref<32xf32, #tpu.memory_space<smem>>
    %c14_i32 = arith.constant 14 : i32
    %321 = vector.broadcast %c14_i32 : i32 to vector<1x256xi32>
    %322 = arith.cmpi sge, %19, %321 : vector<1x256xi32>
    %323 = vector.extract_strided_slice %179 {offsets = [0, 242], sizes = [1, 14], strides = [1, 1]} : vector<1x256xf32> to vector<1x14xf32>
    %324 = vector.extract_strided_slice %179 {offsets = [0, 0], sizes = [1, 242], strides = [1, 1]} : vector<1x256xf32> to vector<1x242xf32>
    %325 = tpu.concatenate %323, %324 in 1 : vector<1x14xf32>, vector<1x242xf32> -> vector<1x256xf32>
    %cst_77 = arith.constant 0.000000e+00 : f32
    %326 = vector.broadcast %cst_77 : f32 to vector<1x256xf32>
    %327 = arith.select %322, %325, %326 : vector<1x256xi1>, vector<1x256xf32>
    %328 = vector.broadcast %320 : f32 to vector<1x256xf32>
    %329 = arith.mulf %328, %327 : vector<1x256xf32>
    %330 = arith.addf %319, %329 : vector<1x256xf32>
    %c15 = arith.constant 15 : index
    %331 = memref.load %arg5[%c15] : memref<32xf32, #tpu.memory_space<smem>>
    %c15_i32 = arith.constant 15 : i32
    %332 = vector.broadcast %c15_i32 : i32 to vector<1x256xi32>
    %333 = arith.cmpi sge, %19, %332 : vector<1x256xi32>
    %334 = vector.extract_strided_slice %179 {offsets = [0, 241], sizes = [1, 15], strides = [1, 1]} : vector<1x256xf32> to vector<1x15xf32>
    %335 = vector.extract_strided_slice %179 {offsets = [0, 0], sizes = [1, 241], strides = [1, 1]} : vector<1x256xf32> to vector<1x241xf32>
    %336 = tpu.concatenate %334, %335 in 1 : vector<1x15xf32>, vector<1x241xf32> -> vector<1x256xf32>
    %cst_78 = arith.constant 0.000000e+00 : f32
    %337 = vector.broadcast %cst_78 : f32 to vector<1x256xf32>
    %338 = arith.select %333, %336, %337 : vector<1x256xi1>, vector<1x256xf32>
    %339 = vector.broadcast %331 : f32 to vector<1x256xf32>
    %340 = arith.mulf %339, %338 : vector<1x256xf32>
    %341 = arith.addf %330, %340 : vector<1x256xf32>
    %c16 = arith.constant 16 : index
    %342 = memref.load %arg5[%c16] : memref<32xf32, #tpu.memory_space<smem>>
    %c16_i32 = arith.constant 16 : i32
    %343 = vector.broadcast %c16_i32 : i32 to vector<1x256xi32>
    %344 = arith.cmpi sge, %19, %343 : vector<1x256xi32>
    %345 = vector.extract_strided_slice %179 {offsets = [0, 240], sizes = [1, 16], strides = [1, 1]} : vector<1x256xf32> to vector<1x16xf32>
    %346 = vector.extract_strided_slice %179 {offsets = [0, 0], sizes = [1, 240], strides = [1, 1]} : vector<1x256xf32> to vector<1x240xf32>
    %347 = tpu.concatenate %345, %346 in 1 : vector<1x16xf32>, vector<1x240xf32> -> vector<1x256xf32>
    %cst_79 = arith.constant 0.000000e+00 : f32
    %348 = vector.broadcast %cst_79 : f32 to vector<1x256xf32>
    %349 = arith.select %344, %347, %348 : vector<1x256xi1>, vector<1x256xf32>
    %350 = vector.broadcast %342 : f32 to vector<1x256xf32>
    %351 = arith.mulf %350, %349 : vector<1x256xf32>
    %352 = arith.addf %341, %351 : vector<1x256xf32>
    %c17 = arith.constant 17 : index
    %353 = memref.load %arg5[%c17] : memref<32xf32, #tpu.memory_space<smem>>
    %c17_i32 = arith.constant 17 : i32
    %354 = vector.broadcast %c17_i32 : i32 to vector<1x256xi32>
    %355 = arith.cmpi sge, %19, %354 : vector<1x256xi32>
    %356 = vector.extract_strided_slice %179 {offsets = [0, 239], sizes = [1, 17], strides = [1, 1]} : vector<1x256xf32> to vector<1x17xf32>
    %357 = vector.extract_strided_slice %179 {offsets = [0, 0], sizes = [1, 239], strides = [1, 1]} : vector<1x256xf32> to vector<1x239xf32>
    %358 = tpu.concatenate %356, %357 in 1 : vector<1x17xf32>, vector<1x239xf32> -> vector<1x256xf32>
    %cst_80 = arith.constant 0.000000e+00 : f32
    %359 = vector.broadcast %cst_80 : f32 to vector<1x256xf32>
    %360 = arith.select %355, %358, %359 : vector<1x256xi1>, vector<1x256xf32>
    %361 = vector.broadcast %353 : f32 to vector<1x256xf32>
    %362 = arith.mulf %361, %360 : vector<1x256xf32>
    %363 = arith.addf %352, %362 : vector<1x256xf32>
    %c18 = arith.constant 18 : index
    %364 = memref.load %arg5[%c18] : memref<32xf32, #tpu.memory_space<smem>>
    %c18_i32 = arith.constant 18 : i32
    %365 = vector.broadcast %c18_i32 : i32 to vector<1x256xi32>
    %366 = arith.cmpi sge, %19, %365 : vector<1x256xi32>
    %367 = vector.extract_strided_slice %179 {offsets = [0, 238], sizes = [1, 18], strides = [1, 1]} : vector<1x256xf32> to vector<1x18xf32>
    %368 = vector.extract_strided_slice %179 {offsets = [0, 0], sizes = [1, 238], strides = [1, 1]} : vector<1x256xf32> to vector<1x238xf32>
    %369 = tpu.concatenate %367, %368 in 1 : vector<1x18xf32>, vector<1x238xf32> -> vector<1x256xf32>
    %cst_81 = arith.constant 0.000000e+00 : f32
    %370 = vector.broadcast %cst_81 : f32 to vector<1x256xf32>
    %371 = arith.select %366, %369, %370 : vector<1x256xi1>, vector<1x256xf32>
    %372 = vector.broadcast %364 : f32 to vector<1x256xf32>
    %373 = arith.mulf %372, %371 : vector<1x256xf32>
    %374 = arith.addf %363, %373 : vector<1x256xf32>
    %c19 = arith.constant 19 : index
    %375 = memref.load %arg5[%c19] : memref<32xf32, #tpu.memory_space<smem>>
    %c19_i32 = arith.constant 19 : i32
    %376 = vector.broadcast %c19_i32 : i32 to vector<1x256xi32>
    %377 = arith.cmpi sge, %19, %376 : vector<1x256xi32>
    %378 = vector.extract_strided_slice %179 {offsets = [0, 237], sizes = [1, 19], strides = [1, 1]} : vector<1x256xf32> to vector<1x19xf32>
    %379 = vector.extract_strided_slice %179 {offsets = [0, 0], sizes = [1, 237], strides = [1, 1]} : vector<1x256xf32> to vector<1x237xf32>
    %380 = tpu.concatenate %378, %379 in 1 : vector<1x19xf32>, vector<1x237xf32> -> vector<1x256xf32>
    %cst_82 = arith.constant 0.000000e+00 : f32
    %381 = vector.broadcast %cst_82 : f32 to vector<1x256xf32>
    %382 = arith.select %377, %380, %381 : vector<1x256xi1>, vector<1x256xf32>
    %383 = vector.broadcast %375 : f32 to vector<1x256xf32>
    %384 = arith.mulf %383, %382 : vector<1x256xf32>
    %385 = arith.addf %374, %384 : vector<1x256xf32>
    %c20 = arith.constant 20 : index
    %386 = memref.load %arg5[%c20] : memref<32xf32, #tpu.memory_space<smem>>
    %c20_i32 = arith.constant 20 : i32
    %387 = vector.broadcast %c20_i32 : i32 to vector<1x256xi32>
    %388 = arith.cmpi sge, %19, %387 : vector<1x256xi32>
    %389 = vector.extract_strided_slice %179 {offsets = [0, 236], sizes = [1, 20], strides = [1, 1]} : vector<1x256xf32> to vector<1x20xf32>
    %390 = vector.extract_strided_slice %179 {offsets = [0, 0], sizes = [1, 236], strides = [1, 1]} : vector<1x256xf32> to vector<1x236xf32>
    %391 = tpu.concatenate %389, %390 in 1 : vector<1x20xf32>, vector<1x236xf32> -> vector<1x256xf32>
    %cst_83 = arith.constant 0.000000e+00 : f32
    %392 = vector.broadcast %cst_83 : f32 to vector<1x256xf32>
    %393 = arith.select %388, %391, %392 : vector<1x256xi1>, vector<1x256xf32>
    %394 = vector.broadcast %386 : f32 to vector<1x256xf32>
    %395 = arith.mulf %394, %393 : vector<1x256xf32>
    %396 = arith.addf %385, %395 : vector<1x256xf32>
    %c21 = arith.constant 21 : index
    %397 = memref.load %arg5[%c21] : memref<32xf32, #tpu.memory_space<smem>>
    %c21_i32 = arith.constant 21 : i32
    %398 = vector.broadcast %c21_i32 : i32 to vector<1x256xi32>
    %399 = arith.cmpi sge, %19, %398 : vector<1x256xi32>
    %400 = vector.extract_strided_slice %179 {offsets = [0, 235], sizes = [1, 21], strides = [1, 1]} : vector<1x256xf32> to vector<1x21xf32>
    %401 = vector.extract_strided_slice %179 {offsets = [0, 0], sizes = [1, 235], strides = [1, 1]} : vector<1x256xf32> to vector<1x235xf32>
    %402 = tpu.concatenate %400, %401 in 1 : vector<1x21xf32>, vector<1x235xf32> -> vector<1x256xf32>
    %cst_84 = arith.constant 0.000000e+00 : f32
    %403 = vector.broadcast %cst_84 : f32 to vector<1x256xf32>
    %404 = arith.select %399, %402, %403 : vector<1x256xi1>, vector<1x256xf32>
    %405 = vector.broadcast %397 : f32 to vector<1x256xf32>
    %406 = arith.mulf %405, %404 : vector<1x256xf32>
    %407 = arith.addf %396, %406 : vector<1x256xf32>
    %c22 = arith.constant 22 : index
    %408 = memref.load %arg5[%c22] : memref<32xf32, #tpu.memory_space<smem>>
    %c22_i32 = arith.constant 22 : i32
    %409 = vector.broadcast %c22_i32 : i32 to vector<1x256xi32>
    %410 = arith.cmpi sge, %19, %409 : vector<1x256xi32>
    %411 = vector.extract_strided_slice %179 {offsets = [0, 234], sizes = [1, 22], strides = [1, 1]} : vector<1x256xf32> to vector<1x22xf32>
    %412 = vector.extract_strided_slice %179 {offsets = [0, 0], sizes = [1, 234], strides = [1, 1]} : vector<1x256xf32> to vector<1x234xf32>
    %413 = tpu.concatenate %411, %412 in 1 : vector<1x22xf32>, vector<1x234xf32> -> vector<1x256xf32>
    %cst_85 = arith.constant 0.000000e+00 : f32
    %414 = vector.broadcast %cst_85 : f32 to vector<1x256xf32>
    %415 = arith.select %410, %413, %414 : vector<1x256xi1>, vector<1x256xf32>
    %416 = vector.broadcast %408 : f32 to vector<1x256xf32>
    %417 = arith.mulf %416, %415 : vector<1x256xf32>
    %418 = arith.addf %407, %417 : vector<1x256xf32>
    %c23 = arith.constant 23 : index
    %419 = memref.load %arg5[%c23] : memref<32xf32, #tpu.memory_space<smem>>
    %c23_i32 = arith.constant 23 : i32
    %420 = vector.broadcast %c23_i32 : i32 to vector<1x256xi32>
    %421 = arith.cmpi sge, %19, %420 : vector<1x256xi32>
    %422 = vector.extract_strided_slice %179 {offsets = [0, 233], sizes = [1, 23], strides = [1, 1]} : vector<1x256xf32> to vector<1x23xf32>
    %423 = vector.extract_strided_slice %179 {offsets = [0, 0], sizes = [1, 233], strides = [1, 1]} : vector<1x256xf32> to vector<1x233xf32>
    %424 = tpu.concatenate %422, %423 in 1 : vector<1x23xf32>, vector<1x233xf32> -> vector<1x256xf32>
    %cst_86 = arith.constant 0.000000e+00 : f32
    %425 = vector.broadcast %cst_86 : f32 to vector<1x256xf32>
    %426 = arith.select %421, %424, %425 : vector<1x256xi1>, vector<1x256xf32>
    %427 = vector.broadcast %419 : f32 to vector<1x256xf32>
    %428 = arith.mulf %427, %426 : vector<1x256xf32>
    %429 = arith.addf %418, %428 : vector<1x256xf32>
    %c24 = arith.constant 24 : index
    %430 = memref.load %arg5[%c24] : memref<32xf32, #tpu.memory_space<smem>>
    %c24_i32 = arith.constant 24 : i32
    %431 = vector.broadcast %c24_i32 : i32 to vector<1x256xi32>
    %432 = arith.cmpi sge, %19, %431 : vector<1x256xi32>
    %433 = vector.extract_strided_slice %179 {offsets = [0, 232], sizes = [1, 24], strides = [1, 1]} : vector<1x256xf32> to vector<1x24xf32>
    %434 = vector.extract_strided_slice %179 {offsets = [0, 0], sizes = [1, 232], strides = [1, 1]} : vector<1x256xf32> to vector<1x232xf32>
    %435 = tpu.concatenate %433, %434 in 1 : vector<1x24xf32>, vector<1x232xf32> -> vector<1x256xf32>
    %cst_87 = arith.constant 0.000000e+00 : f32
    %436 = vector.broadcast %cst_87 : f32 to vector<1x256xf32>
    %437 = arith.select %432, %435, %436 : vector<1x256xi1>, vector<1x256xf32>
    %438 = vector.broadcast %430 : f32 to vector<1x256xf32>
    %439 = arith.mulf %438, %437 : vector<1x256xf32>
    %440 = arith.addf %429, %439 : vector<1x256xf32>
    %c25 = arith.constant 25 : index
    %441 = memref.load %arg5[%c25] : memref<32xf32, #tpu.memory_space<smem>>
    %c25_i32 = arith.constant 25 : i32
    %442 = vector.broadcast %c25_i32 : i32 to vector<1x256xi32>
    %443 = arith.cmpi sge, %19, %442 : vector<1x256xi32>
    %444 = vector.extract_strided_slice %179 {offsets = [0, 231], sizes = [1, 25], strides = [1, 1]} : vector<1x256xf32> to vector<1x25xf32>
    %445 = vector.extract_strided_slice %179 {offsets = [0, 0], sizes = [1, 231], strides = [1, 1]} : vector<1x256xf32> to vector<1x231xf32>
    %446 = tpu.concatenate %444, %445 in 1 : vector<1x25xf32>, vector<1x231xf32> -> vector<1x256xf32>
    %cst_88 = arith.constant 0.000000e+00 : f32
    %447 = vector.broadcast %cst_88 : f32 to vector<1x256xf32>
    %448 = arith.select %443, %446, %447 : vector<1x256xi1>, vector<1x256xf32>
    %449 = vector.broadcast %441 : f32 to vector<1x256xf32>
    %450 = arith.mulf %449, %448 : vector<1x256xf32>
    %451 = arith.addf %440, %450 : vector<1x256xf32>
    %c26 = arith.constant 26 : index
    %452 = memref.load %arg5[%c26] : memref<32xf32, #tpu.memory_space<smem>>
    %c26_i32 = arith.constant 26 : i32
    %453 = vector.broadcast %c26_i32 : i32 to vector<1x256xi32>
    %454 = arith.cmpi sge, %19, %453 : vector<1x256xi32>
    %455 = vector.extract_strided_slice %179 {offsets = [0, 230], sizes = [1, 26], strides = [1, 1]} : vector<1x256xf32> to vector<1x26xf32>
    %456 = vector.extract_strided_slice %179 {offsets = [0, 0], sizes = [1, 230], strides = [1, 1]} : vector<1x256xf32> to vector<1x230xf32>
    %457 = tpu.concatenate %455, %456 in 1 : vector<1x26xf32>, vector<1x230xf32> -> vector<1x256xf32>
    %cst_89 = arith.constant 0.000000e+00 : f32
    %458 = vector.broadcast %cst_89 : f32 to vector<1x256xf32>
    %459 = arith.select %454, %457, %458 : vector<1x256xi1>, vector<1x256xf32>
    %460 = vector.broadcast %452 : f32 to vector<1x256xf32>
    %461 = arith.mulf %460, %459 : vector<1x256xf32>
    %462 = arith.addf %451, %461 : vector<1x256xf32>
    %c27 = arith.constant 27 : index
    %463 = memref.load %arg5[%c27] : memref<32xf32, #tpu.memory_space<smem>>
    %c27_i32 = arith.constant 27 : i32
    %464 = vector.broadcast %c27_i32 : i32 to vector<1x256xi32>
    %465 = arith.cmpi sge, %19, %464 : vector<1x256xi32>
    %466 = vector.extract_strided_slice %179 {offsets = [0, 229], sizes = [1, 27], strides = [1, 1]} : vector<1x256xf32> to vector<1x27xf32>
    %467 = vector.extract_strided_slice %179 {offsets = [0, 0], sizes = [1, 229], strides = [1, 1]} : vector<1x256xf32> to vector<1x229xf32>
    %468 = tpu.concatenate %466, %467 in 1 : vector<1x27xf32>, vector<1x229xf32> -> vector<1x256xf32>
    %cst_90 = arith.constant 0.000000e+00 : f32
    %469 = vector.broadcast %cst_90 : f32 to vector<1x256xf32>
    %470 = arith.select %465, %468, %469 : vector<1x256xi1>, vector<1x256xf32>
    %471 = vector.broadcast %463 : f32 to vector<1x256xf32>
    %472 = arith.mulf %471, %470 : vector<1x256xf32>
    %473 = arith.addf %462, %472 : vector<1x256xf32>
    %c28 = arith.constant 28 : index
    %474 = memref.load %arg5[%c28] : memref<32xf32, #tpu.memory_space<smem>>
    %c28_i32 = arith.constant 28 : i32
    %475 = vector.broadcast %c28_i32 : i32 to vector<1x256xi32>
    %476 = arith.cmpi sge, %19, %475 : vector<1x256xi32>
    %477 = vector.extract_strided_slice %179 {offsets = [0, 228], sizes = [1, 28], strides = [1, 1]} : vector<1x256xf32> to vector<1x28xf32>
    %478 = vector.extract_strided_slice %179 {offsets = [0, 0], sizes = [1, 228], strides = [1, 1]} : vector<1x256xf32> to vector<1x228xf32>
    %479 = tpu.concatenate %477, %478 in 1 : vector<1x28xf32>, vector<1x228xf32> -> vector<1x256xf32>
    %cst_91 = arith.constant 0.000000e+00 : f32
    %480 = vector.broadcast %cst_91 : f32 to vector<1x256xf32>
    %481 = arith.select %476, %479, %480 : vector<1x256xi1>, vector<1x256xf32>
    %482 = vector.broadcast %474 : f32 to vector<1x256xf32>
    %483 = arith.mulf %482, %481 : vector<1x256xf32>
    %484 = arith.addf %473, %483 : vector<1x256xf32>
    %c29 = arith.constant 29 : index
    %485 = memref.load %arg5[%c29] : memref<32xf32, #tpu.memory_space<smem>>
    %c29_i32 = arith.constant 29 : i32
    %486 = vector.broadcast %c29_i32 : i32 to vector<1x256xi32>
    %487 = arith.cmpi sge, %19, %486 : vector<1x256xi32>
    %488 = vector.extract_strided_slice %179 {offsets = [0, 227], sizes = [1, 29], strides = [1, 1]} : vector<1x256xf32> to vector<1x29xf32>
    %489 = vector.extract_strided_slice %179 {offsets = [0, 0], sizes = [1, 227], strides = [1, 1]} : vector<1x256xf32> to vector<1x227xf32>
    %490 = tpu.concatenate %488, %489 in 1 : vector<1x29xf32>, vector<1x227xf32> -> vector<1x256xf32>
    %cst_92 = arith.constant 0.000000e+00 : f32
    %491 = vector.broadcast %cst_92 : f32 to vector<1x256xf32>
    %492 = arith.select %487, %490, %491 : vector<1x256xi1>, vector<1x256xf32>
    %493 = vector.broadcast %485 : f32 to vector<1x256xf32>
    %494 = arith.mulf %493, %492 : vector<1x256xf32>
    %495 = arith.addf %484, %494 : vector<1x256xf32>
    %c30 = arith.constant 30 : index
    %496 = memref.load %arg5[%c30] : memref<32xf32, #tpu.memory_space<smem>>
    %c30_i32 = arith.constant 30 : i32
    %497 = vector.broadcast %c30_i32 : i32 to vector<1x256xi32>
    %498 = arith.cmpi sge, %19, %497 : vector<1x256xi32>
    %499 = vector.extract_strided_slice %179 {offsets = [0, 226], sizes = [1, 30], strides = [1, 1]} : vector<1x256xf32> to vector<1x30xf32>
    %500 = vector.extract_strided_slice %179 {offsets = [0, 0], sizes = [1, 226], strides = [1, 1]} : vector<1x256xf32> to vector<1x226xf32>
    %501 = tpu.concatenate %499, %500 in 1 : vector<1x30xf32>, vector<1x226xf32> -> vector<1x256xf32>
    %cst_93 = arith.constant 0.000000e+00 : f32
    %502 = vector.broadcast %cst_93 : f32 to vector<1x256xf32>
    %503 = arith.select %498, %501, %502 : vector<1x256xi1>, vector<1x256xf32>
    %504 = vector.broadcast %496 : f32 to vector<1x256xf32>
    %505 = arith.mulf %504, %503 : vector<1x256xf32>
    %506 = arith.addf %495, %505 : vector<1x256xf32>
    %c31 = arith.constant 31 : index
    %507 = memref.load %arg5[%c31] : memref<32xf32, #tpu.memory_space<smem>>
    %c31_i32 = arith.constant 31 : i32
    %508 = vector.broadcast %c31_i32 : i32 to vector<1x256xi32>
    %509 = arith.cmpi sge, %19, %508 : vector<1x256xi32>
    %510 = vector.extract_strided_slice %179 {offsets = [0, 225], sizes = [1, 31], strides = [1, 1]} : vector<1x256xf32> to vector<1x31xf32>
    %511 = vector.extract_strided_slice %179 {offsets = [0, 0], sizes = [1, 225], strides = [1, 1]} : vector<1x256xf32> to vector<1x225xf32>
    %512 = tpu.concatenate %510, %511 in 1 : vector<1x31xf32>, vector<1x225xf32> -> vector<1x256xf32>
    %cst_94 = arith.constant 0.000000e+00 : f32
    %513 = vector.broadcast %cst_94 : f32 to vector<1x256xf32>
    %514 = arith.select %509, %512, %513 : vector<1x256xi1>, vector<1x256xf32>
    %515 = vector.broadcast %507 : f32 to vector<1x256xf32>
    %516 = arith.mulf %515, %514 : vector<1x256xf32>
    %517 = arith.addf %506, %516 : vector<1x256xf32>
    %c0_95 = arith.constant 0 : index
    %c0_96 = arith.constant 0 : index
    %c0_97 = arith.constant 0 : index
    %518 = vector.load %arg6[%c0_95, %c0_96, %c0_97] : memref<1x1x256xf32, #tpu.memory_space<vmem>>, vector<1x1x256xf32>
    %519 = vector.shape_cast %518 : vector<1x1x256xf32> to vector<1x256xf32>
    %520 = vector.shape_cast %517 : vector<1x256xf32> to vector<1x1x256xf32>
    tpu.vector_store %arg6[%c0_95, %c0_96, %c0_97], %520 {strides = array<i32>} : memref<1x1x256xf32, #tpu.memory_space<vmem>>, vector<1x1x256xf32>,
    return
  }
  func.func @transform_0(%arg0: i32) -> (i32, i32, i32) {
    %c0_i32 = arith.constant 0 : i32
    %c0_i32_0 = arith.constant 0 : i32
    %c0_i32_1 = arith.constant 0 : i32
    return %arg0, %c0_i32, %c0_i32_0 : i32, i32, i32
  }
  func.func @transform_1(%arg0: i32) -> (i32, i32) {
    %c0_i32 = arith.constant 0 : i32
    %c0_i32_0 = arith.constant 0 : i32
    %c0_i32_1 = arith.constant 0 : i32
    return %c0_i32, %c0_i32_0 : i32, i32
  }
  func.func @transform_2(%arg0: i32) -> (i32, i32, i32) {
    %c0_i32 = arith.constant 0 : i32
    %c0_i32_0 = arith.constant 0 : i32
    %c0_i32_1 = arith.constant 0 : i32
    %c0_i32_2 = arith.constant 0 : i32
    return %c0_i32, %c0_i32_0, %c0_i32_1 : i32, i32, i32
  }
  func.func @transform_3(%arg0: i32) -> (i32, i32, i32) {
    %c0_i32 = arith.constant 0 : i32
    %c0_i32_0 = arith.constant 0 : i32
    %c0_i32_1 = arith.constant 0 : i32
    %c0_i32_2 = arith.constant 0 : i32
    return %c0_i32, %c0_i32_0, %c0_i32_1 : i32, i32, i32
  }
  func.func @transform_4(%arg0: i32) -> i32 {
    %c0_i32 = arith.constant 0 : i32
    %c0_i32_0 = arith.constant 0 : i32
    return %c0_i32 : i32
  }
  func.func @transform_5(%arg0: i32) -> (i32, i32, i32) {
    %c0_i32 = arith.constant 0 : i32
    %c0_i32_0 = arith.constant 0 : i32
    %c0_i32_1 = arith.constant 0 : i32
    return %arg0, %c0_i32, %c0_i32_0 : i32, i32, i32
  }
}

</mosaic_0001>

<bundles_post_ra>
// kernel: fwd.1
= control target key start
LH: loop header
LB: loop body
LE: loop exit
PB: predicated region body
PF: predicated region fallthrough
CT: control target
= control target key end

     0   :  { %10 = vsyncpa [#allocation4], 0  ;;  %s2801_s0 = inlined_call_operand.vmem [shape: f32[1,1,256], index: 0, kind: input, shape index: {}]   ;;  %s2802_s1 = inlined_call_operand.vmem [shape: f32[4,2], index: 1, kind: input, shape index: {}]   ;;  %s2803_s2 = inlined_call_operand.vmem [shape: f32[4,8,13], index: 2, kind: input, shape index: {}]   ;;  %s2804_s3 = inlined_call_operand.vmem [shape: f32[4,5,5], index: 3, kind: input, shape index: {}]   ;;  %s2805_s4 = inlined_call_operand.vmem [shape: f32[32], index: 4, kind: input, shape index: {}]   ;;  %s2806_s5 = inlined_call_operand.hbm [shape: f32[1,1,256], index: 5, kind: output, shape index: {}]  }
   0x1   :  { %11 = vsyncpa [#allocation3], 0  ;;  %s26_s20 = sshll.u32 %s2805_s4, 4  ;;  %s27_s20 = int_to_ptr.vmem [resolvable:$true] %s26_s20 }
   0x2   :  { %s1853_s21 = scalar_lea.vmem %s27_s20, 16  ;;  %p1858_p1 = scmp.lt.s32.totalorder %s27_s20, %s27_s20 }
   0x3   :  { %p1854_p0 = scmp.ne.s32.totalorder %s27_s20, %s1853_s21  ;;  %p1859_p2 = scmp.lt.s32.totalorder %s1853_s21, %s1853_s21 }
   0x5   :  { %p1860_p3 = por %p1859_p2, %p1858_p1 }
   0x7   :  { %p1861_p4 = pnand %p1860_p3, %p1854_p0 }
   0x9   :  { %1864 = shalt.err (!%p1861_p4)
}
   0xa   :  { %s1891_s22 = smov [#allocation2]  }
   0xb   :  { %29 = dma.vmem_to_smem %s27_s20, 16, %s1891_s22, [#allocation4]  }
   0xc   :  { %1887 = dma.done.wait [#allocation4], 16  }
   0xd   :  { %1888 = vsyncadd [#allocation4], 4294967280 }
   0xe   :  { %33 = sfence }
   0xf   :  { %v62_v0 = vld [vmem:[%s2802_s1] sm:$0xf]  ;;  %v1892_v1 = vmov 0   ;;  %v1893_v2 = vmov 1   ;;  %v35_v3 = vlaneseq  ;;  %s1894_s1 = smov 1   ;;  %v1895_v17 = vmov 0.0  }
  0x10   :  { %1779 = vset.pattern.permute.xlu0 %v1892_v1  ;;  %v34_v7 = vld [vmem:[%s2801_s0] sm:$0x3]  ;;  %212 = vmatprep.mubr.f32.mxu0 %v1895_v17  ;;  %s1896_s0 = smov 2   ;;  %vm114_vm0 = vcmask 7168   ;;  %vm96_vm3 = vcmask 15360   ;;  %vm131_vm6 = vcmask 1043456  }
  0x11   :  { %65 = vperm.xlu0 %1779, %v62_v0   ;;  %v1966_v4 = vshrl.u32 %v35_v3, 7  ;;  %314 = vmatprep.mubr.f32.mxu1 %v1895_v17  ;;  %v1984_v18 = vand.u32 127, %v35_v3  ;;  %vm141_vm7 = vcmask 1044480   ;;  %vm1897_vm8 = vmmov 1   ;;  %v136_v44 = vld [vmem:[%s2803_s2] sm:$0xff]  ;;  %s1898_s30 = smov 4  }
  0x12   :  { %vm2009_vm9 = vmpackc.low %vm141_vm7, %vm1897_vm8  ;;  %vm137_vm10 = vcmask 105472   ;;  %v239_v62 = vld [vmem:[%s2804_s3] sm:$0x1f]  ;;  %vm240_vm11 = vcmask 39936   ;;  %vm334_vm12 = vcmask 31744   ;;  %s1900_s17 = smov 5  }
  0x13   :  { %v71_v5 = vsub.s32 0, %v1966_v4  ;;  %v75_v6 = vsub.s32 1, %v1966_v4  ;;  %v37_v19 = vadd.s32 128, %v1984_v18  ;;  %vm107_vm1 = vcmp.ge.s32.totalorder %v1984_v18, 1  ;;  %s1901_s18 = smov 6   ;;  %s1902_s19 = smov 7  }
  0x14   :  { %vm87_vm5 = vcmp.ge.s32.totalorder %v1984_v18, 2  ;;  %vm325_vm13 = vcmp.ge.s32.totalorder %v1984_v18, 4  ;;  %s1903_s20 = smov 8   ;;  %s1904_s21 = smov 9   ;;  %vm1044_vm15 = vcmp.ge.s32.totalorder %v1984_v18, 3 }
  0x15   :  { %1780 = vset.pattern.permute.xlu0 %v1893_v2  ;;  %v72_v9 = vrot.slane %v34_v7, %v71_v5  ;;  %v76_v10 = vrot.slane %v34_v7, %v75_v6  ;;  %v1987_v20 = vand.u32 127, %v37_v19  ;;  %s1905_s22 = smov 10   ;;  %s1906_s23 = smov 11  }
  0x16   :  { %82 = vperm.xlu0 %1780, %v62_v0   ;;  %s1907_s24 = smov 12   ;;  %s1908_s4 = smov 13  }
  0x17   :  { %vm108_vm2 = vcmp.ge.s32.totalorder %v1987_v20, 1  ;;  %vm88_vm4 = vcmp.ge.s32.totalorder %v1987_v20, 2  ;;  %vm326_vm14 = vcmp.ge.s32.totalorder %v1987_v20, 4  ;;  %s1909_s25 = smov 14   ;;  %s1912_s26 = smov 17   ;;  %vm1082_vm8 = vcmp.ge.s32.totalorder %v1987_v20, 5 }
  0x18   :  { %s1913_s27 = smov 18   ;;  %s1914_s28 = smov 19  }
  0x19   :  { %s1915_s29 = smov 20   ;;  %s1917_s6 = smov 22  }
  0x1a   :  { %s1918_s7 = smov 23   ;;  %s1919_s8 = smov 24  }
  0x1b   :  { %s1920_s9 = smov 25   ;;  %s1921_s10 = smov 26  }
  0x1c   :  { %s1922_s11 = smov 27   ;;  %s1923_s12 = smov 28  }
  0x1d   :  { %s1924_s13 = smov 29   ;;  %s1925_s14 = smov 30  }
  0x1e   :  { %s1926_s15 = smov 31   ;;  %s2272_s16 = sld [smem:[#allocation2 + $0x1]] }
  0x90   :  { %v66_v8 = vpop.permute.xlu0 %65 }
  0x91   :  { %v79_v11 = vmul.f32 %v72_v9, %v66_v8  ;;  %v80_v12 = vmul.f32 %v76_v10, %v66_v8 }
  0x95   :  { %v83_v13 = vpop.permute.xlu0 %82 }
  0x96   :  { %v1973_v14 = vadd.f32 %v83_v13, %v79_v11  ;;  %v1975_v15 = vadd.f32 %v83_v13, %v80_v12 }
  0x98   :  { %v1781_v16 = vpack.i.bf16 %v1973_v14, %v1975_v15  ;;  %v135_v38 = vsel %vm131_vm6, %v1975_v15, 1.0  ;;  %v134_v41 = vsel %vm131_vm6, %v1973_v14, 1.0 }
  0x9a   :  { %1782 = vrot.lane.b32.xlu1 %v1781_v16, %s1894_s1 }
  0x9e   :  { %1787 = vrot.lane.b32.xlu1 %v1781_v16, %s1896_s0 }
 0x10c   :  { %v1783_v21 = vpop.permute.xlu1 %1782 }
 0x10d   :  { %v1785_v22 = vunpack.i.h.bf16 %v1783_v21  ;;  %v1784_v23 = vunpack.i.l.bf16 %v1783_v21 }
 0x10f   :  { %v115_v24 = vsel %vm114_vm0, %v1785_v22, %v1784_v23  ;;  %v118_v25 = vsel %vm114_vm0, %v1784_v23, %v1785_v22 }
 0x110   :  { %v123_v26 = vsel %vm107_vm1, %v118_v25, 0.0  ;;  %v1788_v27 = vpop.permute.xlu1 %1787  ;;  %v124_v28 = vsel %vm108_vm2, %v115_v24, 0.0 }
 0x111   :  { %v1790_v29 = vunpack.i.h.bf16 %v1788_v27  ;;  %v1789_v30 = vunpack.i.l.bf16 %v1788_v27  ;;  %v127_v31 = vrot.slane %v123_v26, 4  ;;  %v128_v34 = vrot.slane %v124_v28, 4 }
 0x113   :  { %v100_v32 = vsel %vm96_vm3, %v1789_v30, %v1790_v29  ;;  %v97_v33 = vsel %vm96_vm3, %v1790_v29, %v1789_v30 }
 0x114   :  { %v106_v35 = vsel %vm88_vm4, %v97_v33, 0.0  ;;  %v105_v36 = vsel %vm87_vm5, %v100_v32, 0.0  ;;  %v1662_v32 = vld [vmem:[%s2803_s2 + $0x8] sm:$0xff] }
 0x115   :  { %v133_v37 = vsel %vm131_vm6, %v106_v35, %v128_v34  ;;  %v132_v40 = vsel %vm131_vm6, %v105_v36, %v127_v31 }
 0x116   :  { %v1717_v42 = vpack.c.bf16 %v135_v38, %v133_v37  ;;  %v1720_v43 = vpack.c.bf16 %v134_v41, %v132_v40 }
 0x118   :  { %1719 = vmatprep.subr.msk.bf16.mxu0 %vm2009_vm9, %v1717_v42 }
 0x119   :  { %1722 = vmatpush1.bf16.msk.msra.mxu0 %vm2009_vm9, %v1720_v43 }
 0x11c   :  { %1658 = vmatmul.mubr.msk.f32.vlgmr.msra.gmra.mrb[0].mxu0 %vm137_vm10, %v136_v44 }
 0x11d   :  { %543 = vmatprep.mubr.f32.mxu0 %v1895_v17 }
 0x1ef   :  { %v214_v45 = vpop.f32.mrb[0].mxu0 }
 0x1f0   :  { %v221_v46 = vmul.f32 0.5, %v214_v45  ;;  %v216_v47 = vpop.f32.mrb[1].mxu0 }
 0x1f1   :  { %v222_v48 = vmul.f32 0.5, %v216_v47 }
 0x1f2   :  { %1821 = vtanh.f32 %v221_v46 }
 0x1f3   :  { %1823 = vtanh.f32 %v222_v48 }
 0x1f4   :  { %1825 = vtanh.f32 %v214_v45 }
 0x1f5   :  { %1827 = vtanh.f32 %v216_v47 }
 0x1fc   :  { %v1822_v49 = vpop.eup %1821 }
 0x1fd   :  { %v1824_v50 = vpop.eup %1823  ;;  %v225_v51 = vmul.f32 0.5, %v1822_v49 }
 0x1fe   :  { %v226_v52 = vmul.f32 0.5, %v1824_v50  ;;  %v1826_v56 = vpop.eup %1825 }
 0x1ff   :  { %v227_v53 = vadd.f32 0.5, %v225_v51  ;;  %v1828_v58 = vpop.eup %1827  ;;  %v1666_v51 = vld [vmem:[%s2804_s3 + $0x8] sm:$0x1f] }
 0x200   :  { %v228_v54 = vadd.f32 0.5, %v226_v52 }
 0x201   :  { %v231_v55 = vrot.slane %v227_v53, 4 }
 0x202   :  { %v232_v57 = vrot.slane %v228_v54, 4 }
 0x203   :  { %v235_v59 = vmul.f32 %v1826_v56, %v231_v55 }
 0x204   :  { %v236_v60 = vmul.f32 %v1828_v58, %v232_v57 }
 0x205   :  { %v237_v63 = vsel %vm131_vm6, %v235_v59, 1.0 }
 0x206   :  { %v238_v61 = vsel %vm131_vm6, %v236_v60, 1.0 }
 0x207   :  { %1659 = vmatprep.subr.msk.mxu1 %vm141_vm7, %v238_v61 }
 0x208   :  { %1660 = vmatpush1.msk.msra.mxu1 %vm141_vm7, %v237_v63 }
 0x209   :  { %1661 = vmatmul.mubr.msk.f32.vlgmr.msra.gmra.mrb[0].mxu1 %vm240_vm11, %v239_v62 }
 0x20a   :  { %441 = vmatprep.mubr.f32.mxu1 %v1895_v17 }
 0x2dc   :  { %v2034_v0 = vpop.f32.mrb[0].mxu1 }
 0x2dd   :  { %v2038_v1 = vadd.f32 %v2034_v0, %v1973_v14  ;;  %v2040_v2 = vpop.f32.mrb[1].mxu1 }
 0x2de   :  { %v2044_v5 = vadd.f32 %v2040_v2, %v1975_v15 }
 0x2df   :  { %v364_v26 = vsel %vm131_vm6, %v2038_v1, 1.0 }
 0x2e0   :  { %v1796_v6 = vpack.i.bf16 %v2038_v1, %v2044_v5  ;;  %v365_v29 = vsel %vm131_vm6, %v2044_v5, 1.0 }
 0x2e2   :  { %1797 = vrot.lane.b32.xlu0 %v1796_v6, %s1898_s30  ;;  %1792 = vrot.lane.b32.xlu1 %v1796_v6, %s1896_s0 }
 0x354   :  { %v1798_v7 = vpop.permute.xlu0 %1797  ;;  %v1793_v8 = vpop.permute.xlu1 %1792 }
 0x355   :  { %v1800_v9 = vunpack.i.h.bf16 %v1798_v7  ;;  %v1799_v10 = vunpack.i.l.bf16 %v1798_v7  ;;  %v1795_v11 = vunpack.i.h.bf16 %v1793_v8  ;;  %v1794_v12 = vunpack.i.l.bf16 %v1793_v8 }
 0x357   :  { %v335_v13 = vsel %vm334_vm12, %v1800_v9, %v1799_v10  ;;  %v338_v14 = vsel %vm334_vm12, %v1799_v10, %v1800_v9  ;;  %v350_v15 = vsel %vm96_vm3, %v1795_v11, %v1794_v12  ;;  %v353_v16 = vsel %vm96_vm3, %v1794_v12, %v1795_v11 }
 0x358   :  { %v354_v19 = vsel %vm87_vm5, %v353_v16, 0.0  ;;  %v355_v21 = vsel %vm88_vm4, %v350_v15, 0.0  ;;  %v343_v24 = vsel %vm325_vm13, %v338_v14, 0.0  ;;  %v344_v25 = vsel %vm326_vm14, %v335_v13, 0.0 }
 0x359   :  { %v358_v22 = vrot.slane %v354_v19, 4  ;;  %v359_v23 = vrot.slane %v355_v21, 4 }
 0x35b   :  { %v362_v27 = vsel %vm131_vm6, %v343_v24, %v358_v22  ;;  %v363_v28 = vsel %vm131_vm6, %v344_v25, %v359_v23  ;;  %v1670_v23 = vld [vmem:[%s2803_s2 + $0x10] sm:$0xff] }
 0x35c   :  { %v1723_v30 = vpack.c.bf16 %v365_v29, %v363_v28  ;;  %v1726_v31 = vpack.c.bf16 %v364_v26, %v362_v27 }
 0x35e   :  { %1725 = vmatprep.subr.msk.bf16.mxu1 %vm2009_vm9, %v1723_v30 }
 0x35f   :  { %1728 = vmatpush1.bf16.msk.msra.mxu1 %vm2009_vm9, %v1726_v31 }
 0x362   :  { %1665 = vmatmul.mubr.msk.f32.vlgmr.msra.gmra.mrb[2].mxu1 %vm137_vm10, %v1662_v32 }
 0x363   :  { %663 = vmatprep.mubr.f32.mxu1 %v1895_v17 }
 0x435   :  { %v443_v33 = vpop.f32.mrb[2].mxu1 }
 0x436   :  { %v450_v34 = vmul.f32 0.5, %v443_v33  ;;  %v445_v35 = vpop.f32.mrb[3].mxu1 }
 0x437   :  { %v451_v36 = vmul.f32 0.5, %v445_v35 }
 0x438   :  { %1829 = vtanh.f32 %v450_v34 }
 0x439   :  { %1831 = vtanh.f32 %v451_v36 }
 0x43a   :  { %1833 = vtanh.f32 %v443_v33 }
 0x43b   :  { %1835 = vtanh.f32 %v445_v35 }
 0x442   :  { %v1830_v37 = vpop.eup %1829 }
 0x443   :  { %v1832_v38 = vpop.eup %1831  ;;  %v454_v40 = vmul.f32 0.5, %v1830_v37 }
 0x444   :  { %v455_v41 = vmul.f32 0.5, %v1832_v38  ;;  %v1834_v45 = vpop.eup %1833 }
 0x445   :  { %v456_v42 = vadd.f32 0.5, %v454_v40  ;;  %v1836_v47 = vpop.eup %1835 }
 0x446   :  { %v457_v43 = vadd.f32 0.5, %v455_v41 }
 0x447   :  { %v460_v44 = vrot.slane %v456_v42, 4  ;;  %v1674_v42 = vld [vmem:[%s2804_s3 + $0x10] sm:$0x1f] }
 0x448   :  { %v461_v46 = vrot.slane %v457_v43, 4 }
 0x449   :  { %v464_v48 = vmul.f32 %v1834_v45, %v460_v44 }
 0x44a   :  { %v465_v49 = vmul.f32 %v1836_v47, %v461_v46 }
 0x44b   :  { %v466_v52 = vsel %vm131_vm6, %v464_v48, 1.0 }
 0x44c   :  { %v467_v50 = vsel %vm131_vm6, %v465_v49, 1.0 }
 0x44d   :  { %1667 = vmatprep.subr.msk.mxu0 %vm141_vm7, %v467_v50 }
 0x44e   :  { %1668 = vmatpush1.msk.msra.mxu0 %vm141_vm7, %v466_v52 }
 0x44f   :  { %1669 = vmatmul.mubr.msk.f32.vlgmr.msra.gmra.mrb[2].mxu0 %vm240_vm11, %v1666_v51 }
 0x450   :  { %765 = vmatprep.mubr.f32.mxu0 %v1895_v17 }
 0x522   :  { %v545_v53 = vpop.f32.mrb[2].mxu0 }
 0x523   :  { %v2089_v54 = vadd.f32 %v545_v53, %v2034_v0  ;;  %v2092_v55 = vadd.f32 %v545_v53, %v2038_v1  ;;  %v547_v56 = vpop.f32.mrb[3].mxu0 }
 0x524   :  { %v2095_v57 = vadd.f32 %v547_v56, %v2040_v2  ;;  %v2098_v58 = vadd.f32 %v547_v56, %v2044_v5 }
 0x525   :  { %v586_v14 = vsel %vm131_vm6, %v2092_v55, 1.0 }
 0x526   :  { %v1806_v59 = vpack.i.bf16 %v2092_v55, %v2098_v58  ;;  %v587_v19 = vsel %vm131_vm6, %v2098_v58, 1.0 }
 0x528   :  { %1807 = vrot.lane.b32.xlu0 %v1806_v59, %s1896_s0  ;;  %1802 = vrot.lane.b32.xlu1 %v1806_v59, %s1894_s1 }
 0x59a   :  { %v1808_v60 = vpop.permute.xlu0 %1807  ;;  %v1803_v61 = vpop.permute.xlu1 %1802 }
 0x59b   :  { %v1810_v62 = vunpack.i.h.bf16 %v1808_v60  ;;  %v1809_v63 = vunpack.i.l.bf16 %v1808_v60  ;;  %v1805_v0 = vunpack.i.h.bf16 %v1803_v61  ;;  %v1804_v1 = vunpack.i.l.bf16 %v1803_v61 }
 0x59d   :  { %v561_v6 = vsel %vm96_vm3, %v1810_v62, %v1809_v63  ;;  %v564_v2 = vsel %vm96_vm3, %v1809_v63, %v1810_v62  ;;  %v572_v5 = vsel %vm114_vm0, %v1805_v0, %v1804_v1  ;;  %v575_v7 = vsel %vm114_vm0, %v1804_v1, %v1805_v0 }
 0x59e   :  { %v576_v8 = vsel %vm107_vm1, %v575_v7, 0.0  ;;  %v577_v9 = vsel %vm108_vm2, %v572_v5, 0.0  ;;  %v565_v12 = vsel %vm87_vm5, %v564_v2, 0.0  ;;  %v566_v13 = vsel %vm88_vm4, %v561_v6, 0.0 }
 0x59f   :  { %v580_v10 = vrot.slane %v576_v8, 4  ;;  %v581_v11 = vrot.slane %v577_v9, 4 }
 0x5a1   :  { %v584_v15 = vsel %vm131_vm6, %v565_v12, %v580_v10  ;;  %v585_v16 = vsel %vm131_vm6, %v566_v13, %v581_v11  ;;  %v1678_v10 = vld [vmem:[%s2803_s2 + $0x18] sm:$0xff]  ;;  %s1003_s2 = sld [smem:[#allocation2]] }
 0x5a2   :  { %v1729_v21 = vpack.c.bf16 %v587_v19, %v585_v16  ;;  %v1732_v22 = vpack.c.bf16 %v586_v14, %v584_v15 }
 0x5a4   :  { %1731 = vmatprep.subr.msk.bf16.mxu1 %vm2009_vm9, %v1729_v21 }
 0x5a5   :  { %1734 = vmatpush1.bf16.msk.msra.mxu1 %vm2009_vm9, %v1732_v22 }
 0x5a8   :  { %1673 = vmatmul.mubr.msk.f32.vlgmr.msra.gmra.mrb[4].mxu1 %vm137_vm10, %v1670_v23 }
 0x5a9   :  { %885 = vmatprep.mubr.f32.mxu1 %v1895_v17 }
 0x67b   :  { %v665_v24 = vpop.f32.mrb[4].mxu1 }
 0x67c   :  { %v672_v25 = vmul.f32 0.5, %v665_v24  ;;  %v667_v26 = vpop.f32.mrb[5].mxu1 }
 0x67d   :  { %v673_v27 = vmul.f32 0.5, %v667_v26 }
 0x67e   :  { %1837 = vtanh.f32 %v672_v25 }
 0x67f   :  { %1839 = vtanh.f32 %v673_v27 }
 0x680   :  { %1841 = vtanh.f32 %v665_v24 }
 0x681   :  { %1843 = vtanh.f32 %v667_v26  ;;  %v1682_v26 = vld [vmem:[%s2804_s3 + $0x18] sm:$0x1f]  ;;  %s1899_s3 = smov 3  }
 0x688   :  { %v1838_v28 = vpop.eup %1837 }
 0x689   :  { %v1840_v29 = vpop.eup %1839  ;;  %v676_v30 = vmul.f32 0.5, %v1838_v28 }
 0x68a   :  { %v677_v31 = vmul.f32 0.5, %v1840_v29  ;;  %v1842_v35 = vpop.eup %1841 }
 0x68b   :  { %v678_v32 = vadd.f32 0.5, %v676_v30  ;;  %v1844_v37 = vpop.eup %1843  ;;  %v915_v30 = vrot.slane %v1682_v26, 4 }
 0x68c   :  { %v679_v33 = vadd.f32 0.5, %v677_v31 }
 0x68d   :  { %v682_v34 = vrot.slane %v678_v32, 4 }
 0x68e   :  { %v683_v36 = vrot.slane %v679_v33, 4 }
 0x68f   :  { %v686_v38 = vmul.f32 %v1842_v35, %v682_v34 }
 0x690   :  { %v687_v40 = vmul.f32 %v1844_v37, %v683_v36 }
 0x691   :  { %v688_v43 = vsel %vm131_vm6, %v686_v38, 1.0 }
 0x692   :  { %v689_v41 = vsel %vm131_vm6, %v687_v40, 1.0 }
 0x693   :  { %1675 = vmatprep.subr.msk.mxu0 %vm141_vm7, %v689_v41 }
 0x694   :  { %1676 = vmatpush1.msk.msra.mxu0 %vm141_vm7, %v688_v43 }
 0x695   :  { %1677 = vmatmul.mubr.msk.f32.vlgmr.msra.gmra.mrb[4].mxu0 %vm240_vm11, %v1674_v42 }
 0x696   :  { %988 = vmatprep.mubr.f32.mxu0 %v1895_v17 }
 0x768   :  { %v767_v44 = vpop.f32.mrb[4].mxu0 }
 0x769   :  { %v2141_v45 = vadd.f32 %v767_v44, %v2089_v54  ;;  %v774_v46 = vadd.f32 %v767_v44, %v2092_v55  ;;  %v769_v47 = vpop.f32.mrb[5].mxu0 }
 0x76a   :  { %v2145_v48 = vadd.f32 %v769_v47, %v2095_v57  ;;  %v775_v49 = vadd.f32 %v769_v47, %v2098_v58 }
 0x76b   :  { %v808_v6 = vsel %vm131_vm6, %v774_v46, 1.0 }
 0x76c   :  { %v1816_v50 = vpack.i.bf16 %v774_v46, %v775_v49  ;;  %v809_v2 = vsel %vm131_vm6, %v775_v49, 1.0 }
 0x76e   :  { %1817 = vrot.lane.b32.xlu0 %v1816_v50, %s1898_s30  ;;  %1812 = vrot.lane.b32.xlu1 %v1816_v50, %s1896_s0 }
 0x7e0   :  { %v1818_v51 = vpop.permute.xlu0 %1817  ;;  %v1813_v52 = vpop.permute.xlu1 %1812 }
 0x7e1   :  { %v1820_v17 = vunpack.i.h.bf16 %v1818_v51  ;;  %v1819_v53 = vunpack.i.l.bf16 %v1818_v51  ;;  %v1815_v56 = vunpack.i.h.bf16 %v1813_v52  ;;  %v1814_v54 = vunpack.i.l.bf16 %v1813_v52 }
 0x7e3   :  { %v783_v59 = vsel %vm334_vm12, %v1820_v17, %v1819_v53  ;;  %v786_v55 = vsel %vm334_vm12, %v1819_v53, %v1820_v17  ;;  %v794_v57 = vsel %vm96_vm3, %v1815_v56, %v1814_v54  ;;  %v797_v60 = vsel %vm96_vm3, %v1814_v54, %v1815_v56 }
 0x7e4   :  { %v798_v58 = vsel %vm87_vm5, %v797_v60, 0.0  ;;  %v799_v61 = vsel %vm88_vm4, %v794_v57, 0.0  ;;  %v787_v0 = vsel %vm325_vm13, %v786_v55, 0.0  ;;  %v788_v1 = vsel %vm326_vm14, %v783_v59, 0.0 }
 0x7e5   :  { %v802_v62 = vrot.slane %v798_v58, 4  ;;  %v803_v63 = vrot.slane %v799_v61, 4  ;;  %v1004_v60 = vstv %s1003_s2  ;;  %v1021_v58 = vstv %s2272_s16  ;;  %s2751_s2 = sld [smem:[#allocation2 + $0x1e]]  ;;  %s2767_s16 = sld [smem:[#allocation2 + $0x1f]] }
 0x7e7   :  { %v806_v5 = vsel %vm131_vm6, %v787_v0, %v802_v62  ;;  %v807_v7 = vsel %vm131_vm6, %v788_v1, %v803_v63 }
 0x7e8   :  { %v1735_v8 = vpack.c.bf16 %v809_v2, %v807_v7  ;;  %v1738_v9 = vpack.c.bf16 %v808_v6, %v806_v5 }
 0x7ea   :  { %1737 = vmatprep.subr.msk.bf16.mxu1 %vm2009_vm9, %v1735_v8 }
 0x7eb   :  { %1740 = vmatpush1.bf16.msk.msra.mxu1 %vm2009_vm9, %v1738_v9  ;;  %vm1107_vm9 = vcmask 48128  }
 0x7ee   :  { %1681 = vmatmul.mubr.msk.f32.vlgmr.msra.gmra.mrb[6].mxu1 %vm137_vm10, %v1678_v10 }
 0x8c1   :  { %v887_v11 = vpop.f32.mrb[6].mxu1 }
 0x8c2   :  { %v894_v12 = vmul.f32 0.5, %v887_v11  ;;  %v889_v13 = vpop.f32.mrb[7].mxu1 }
 0x8c3   :  { %v895_v14 = vmul.f32 0.5, %v889_v13 }
 0x8c4   :  { %1845 = vtanh.f32 %v894_v12 }
 0x8c5   :  { %1847 = vtanh.f32 %v895_v14 }
 0x8c6   :  { %1849 = vtanh.f32 %v887_v11 }
 0x8c7   :  { %1851 = vtanh.f32 %v889_v13 }
 0x8ce   :  { %v1846_v15 = vpop.eup %1845 }
 0x8cf   :  { %v1848_v16 = vpop.eup %1847  ;;  %v898_v19 = vmul.f32 0.5, %v1846_v15 }
 0x8d0   :  { %v899_v21 = vmul.f32 0.5, %v1848_v16  ;;  %v1850_v24 = vpop.eup %1849 }
 0x8d1   :  { %v900_v39 = vadd.f32 0.5, %v898_v19  ;;  %v1852_v27 = vpop.eup %1851 }
 0x8d2   :  { %v901_v22 = vadd.f32 0.5, %v899_v21 }
 0x8d3   :  { %v904_v23 = vrot.slane %v900_v39, 4 }
 0x8d4   :  { %v905_v25 = vrot.slane %v901_v22, 4 }
 0x8d5   :  { %v908_v28 = vmul.f32 %v1850_v24, %v904_v23 }
 0x8d6   :  { %v909_v29 = vmul.f32 %v1852_v27, %v905_v25 }
 0x8d7   :  { %v910_v32 = vsel %vm131_vm6, %v908_v28, 1.0 }
 0x8d8   :  { %v911_v31 = vsel %vm131_vm6, %v909_v29, 1.0  ;;  %vm1045_vm6 = vcmp.ge.s32.totalorder %v1987_v20, 3 }
 0x8d9   :  { %1683 = vmatprep.subr.msk.mxu0 %vm141_vm7, %v911_v31 }
 0x8da   :  { %1684 = vmatpush1.msk.msra.mxu0 %vm141_vm7, %v910_v32  ;;  %vm1051_vm7 = vcmask 23552  }
 0x8db   :  { %1685 = vmatmul.mubr.msk.f32.vlgmr.msra.gmra.mrb[6].mxu0 %vm240_vm11, %v915_v30 }
 0x9ae   :  { %v990_v33 = vpop.f32.mrb[6].mxu0 }
 0x9af   :  { %v997_v34 = vrot.slane %v990_v33, 4  ;;  %v992_v35 = vpop.f32.mrb[7].mxu0 }
 0x9b0   :  { %v998_v36 = vrot.slane %v992_v35, 4 }
 0x9b1   :  { %v2183_v37 = vadd.f32 %v997_v34, %v2141_v45 }
 0x9b2   :  { %v2186_v38 = vadd.f32 %v998_v36, %v2145_v48 }
 0x9b3   :  { %1013 = vrot.lane.b32.xlu0 %v2183_v37, %s1894_s1  ;;  %v1005_v2 = vmul.f32 %v1004_v60, %v2183_v37 }
 0x9b4   :  { %1009 = vrot.lane.b32.xlu1 %v2186_v38, %s1894_s1  ;;  %s1910_s1 = smov 15   ;;  %v1006_v5 = vmul.f32 %v1004_v60, %v2186_v38 }
 0x9b7   :  { %1030 = vrot.lane.b32.xlu0 %v2183_v37, %s1896_s0 }
 0x9b8   :  { %1027 = vrot.lane.b32.xlu1 %v2186_v38, %s1896_s0  ;;  %s1911_s0 = smov 16  }
 0x9bb   :  { %1049 = vrot.lane.b32.xlu0 %v2183_v37, %s1899_s3 }
 0x9bc   :  { %1046 = vrot.lane.b32.xlu1 %v2186_v38, %s1899_s3  ;;  %s2274_s3 = sld [smem:[#allocation2 + $0x2]] }
 0x9bf   :  { %1067 = vrot.lane.b32.xlu0 %v2183_v37, %s1898_s30 }
 0x9c0   :  { %1064 = vrot.lane.b32.xlu1 %v2186_v38, %s1898_s30  ;;  %s1916_s30 = smov 21  }
 0x9c2   :  { %v1038_v63 = vstv %s2274_s3  ;;  %s1928_s3 = smov [#allocation5]  }
 0x9c3   :  { %1086 = vrot.lane.b32.xlu0 %v2183_v37, %s1900_s17 }
 0x9c4   :  { %1083 = vrot.lane.b32.xlu1 %v2186_v38, %s1900_s17  ;;  %s2278_s17 = sld [smem:[#allocation2 + $0x3]] }
 0x9c7   :  { %1105 = vrot.lane.b32.xlu0 %v2183_v37, %s1901_s18 }
 0x9c8   :  { %1102 = vrot.lane.b32.xlu1 %v2186_v38, %s1901_s18  ;;  %s2282_s18 = sld [smem:[#allocation2 + $0x4]] }
 0x9ca   :  { %v1058_v1 = vstv %s2278_s17  ;;  %s1647_s17 = sshll.u32 %s1928_s3, 4  ;;  %s1648_s17 = int_to_ptr.vmem [resolvable:$true] %s1647_s17 }
 0x9cb   :  { %1125 = vrot.lane.b32.xlu0 %v2183_v37, %s1902_s19  ;;  %p1870_p6 = scmp.lt.s32.totalorder %s1648_s17, %s1648_s17 }
 0x9cc   :  { %1122 = vrot.lane.b32.xlu1 %v2186_v38, %s1902_s19  ;;  %s2284_s19 = sld [smem:[#allocation2 + $0x5]] }
 0x9ce   :  { %v1075_v11 = vstv %s2282_s18  ;;  %s1865_s18 = scalar_lea.vmem %s1648_s17, 32 }
 0x9cf   :  { %1145 = vrot.lane.b32.xlu0 %v2183_v37, %s1903_s20  ;;  %p1866_p5 = scmp.ne.s32.totalorder %s1648_s17, %s1865_s18  ;;  %p1871_p7 = scmp.lt.s32.totalorder %s1865_s18, %s1865_s18 }
 0x9d0   :  { %1142 = vrot.lane.b32.xlu1 %v2186_v38, %s1903_s20  ;;  %s2286_s20 = sld [smem:[#allocation2 + $0x6]] }
 0x9d1   :  { %p1872_p8 = por %p1871_p7, %p1870_p6 }
 0x9d2   :  { %v1094_v12 = vstv %s2284_s19 }
 0x9d3   :  { %1165 = vrot.lane.b32.xlu0 %v2183_v37, %s1904_s21  ;;  %p1873_p9 = pnand %p1872_p8, %p1866_p5 }
 0x9d4   :  { %1162 = vrot.lane.b32.xlu1 %v2186_v38, %s1904_s21  ;;  %s2292_s21 = sld [smem:[#allocation2 + $0x7]] }
 0x9d6   :  { %v1114_v13 = vstv %s2286_s20 }
 0x9d7   :  { %1185 = vrot.lane.b32.xlu0 %v2183_v37, %s1905_s22 }
 0x9d8   :  { %1182 = vrot.lane.b32.xlu1 %v2186_v38, %s1905_s22  ;;  %s2303_s22 = sld [smem:[#allocation2 + $0x8]] }
 0x9da   :  { %v1134_v26 = vstv %s2292_s21 }
 0x9db   :  { %1205 = vrot.lane.b32.xlu0 %v2183_v37, %s1906_s23 }
 0x9dc   :  { %1202 = vrot.lane.b32.xlu1 %v2186_v38, %s1906_s23  ;;  %s2334_s23 = sld [smem:[#allocation2 + $0x9]] }
 0x9de   :  { %v1154_v34 = vstv %s2303_s22 }
 0x9df   :  { %1225 = vrot.lane.b32.xlu0 %v2183_v37, %s1907_s24 }
 0x9e0   :  { %1222 = vrot.lane.b32.xlu1 %v2186_v38, %s1907_s24  ;;  %s2336_s24 = sld [smem:[#allocation2 + $0xa]] }
 0x9e3   :  { %1245 = vrot.lane.b32.xlu0 %v2183_v37, %s1908_s4 }
 0x9e4   :  { %1242 = vrot.lane.b32.xlu1 %v2186_v38, %s1908_s4  ;;  %s2352_s4 = sld [smem:[#allocation2 + $0xb]] }
 0x9e7   :  { %1264 = vrot.lane.b32.xlu0 %v2183_v37, %s1909_s25 }
 0x9e8   :  { %1261 = vrot.lane.b32.xlu1 %v2186_v38, %s1909_s25  ;;  %s2382_s25 = sld [smem:[#allocation2 + $0xc]] }
 0x9eb   :  { %1284 = vrot.lane.b32.xlu0 %v2183_v37, %s1910_s1 }
 0x9ec   :  { %1281 = vrot.lane.b32.xlu1 %v2186_v38, %s1910_s1  ;;  %s2384_s1 = sld [smem:[#allocation2 + $0xd]] }
 0x9ef   :  { %1304 = vrot.lane.b32.xlu0 %v2183_v37, %s1911_s0 }
 0x9f0   :  { %1301 = vrot.lane.b32.xlu1 %v2186_v38, %s1911_s0  ;;  %s2429_s0 = sld [smem:[#allocation2 + $0xe]] }
 0x9f3   :  { %1324 = vrot.lane.b32.xlu0 %v2183_v37, %s1912_s26 }
 0x9f4   :  { %1321 = vrot.lane.b32.xlu1 %v2186_v38, %s1912_s26  ;;  %s2431_s26 = sld [smem:[#allocation2 + $0xf]] }
 0x9f7   :  { %1344 = vrot.lane.b32.xlu0 %v2183_v37, %s1913_s27 }
 0x9f8   :  { %1341 = vrot.lane.b32.xlu1 %v2186_v38, %s1913_s27  ;;  %s2453_s27 = sld [smem:[#allocation2 + $0x10]] }
 0x9fb   :  { %1364 = vrot.lane.b32.xlu0 %v2183_v37, %s1914_s28 }
 0x9fc   :  { %1361 = vrot.lane.b32.xlu1 %v2186_v38, %s1914_s28  ;;  %s2474_s28 = sld [smem:[#allocation2 + $0x11]] }
 0x9ff   :  { %1384 = vrot.lane.b32.xlu0 %v2183_v37, %s1915_s29 }
 0xa00   :  { %1381 = vrot.lane.b32.xlu1 %v2186_v38, %s1915_s29  ;;  %s2491_s29 = sld [smem:[#allocation2 + $0x12]] }
 0xa03   :  { %1404 = vrot.lane.b32.xlu0 %v2183_v37, %s1916_s30 }
 0xa04   :  { %1401 = vrot.lane.b32.xlu1 %v2186_v38, %s1916_s30  ;;  %s2538_s30 = sld [smem:[#allocation2 + $0x13]] }
 0xa07   :  { %1424 = vrot.lane.b32.xlu0 %v2183_v37, %s1917_s6 }
 0xa08   :  { %1421 = vrot.lane.b32.xlu1 %v2186_v38, %s1917_s6  ;;  %s2540_s6 = sld [smem:[#allocation2 + $0x14]] }
 0xa0b   :  { %1444 = vrot.lane.b32.xlu0 %v2183_v37, %s1918_s7 }
 0xa0c   :  { %1441 = vrot.lane.b32.xlu1 %v2186_v38, %s1918_s7  ;;  %s2560_s7 = sld [smem:[#allocation2 + $0x15]] }
 0xa0f   :  { %1464 = vrot.lane.b32.xlu0 %v2183_v37, %s1919_s8 }
 0xa10   :  { %1461 = vrot.lane.b32.xlu1 %v2186_v38, %s1919_s8  ;;  %s2598_s8 = sld [smem:[#allocation2 + $0x16]] }
 0xa13   :  { %1484 = vrot.lane.b32.xlu0 %v2183_v37, %s1920_s9 }
 0xa14   :  { %1481 = vrot.lane.b32.xlu1 %v2186_v38, %s1920_s9  ;;  %s2616_s9 = sld [smem:[#allocation2 + $0x17]] }
 0xa17   :  { %1504 = vrot.lane.b32.xlu0 %v2183_v37, %s1921_s10 }
 0xa18   :  { %1501 = vrot.lane.b32.xlu1 %v2186_v38, %s1921_s10  ;;  %s2641_s10 = sld [smem:[#allocation2 + $0x18]] }
 0xa1b   :  { %1524 = vrot.lane.b32.xlu0 %v2183_v37, %s1922_s11 }
 0xa1c   :  { %1521 = vrot.lane.b32.xlu1 %v2186_v38, %s1922_s11  ;;  %s2658_s11 = sld [smem:[#allocation2 + $0x19]] }
 0xa1f   :  { %1544 = vrot.lane.b32.xlu0 %v2183_v37, %s1923_s12 }
 0xa20   :  { %1541 = vrot.lane.b32.xlu1 %v2186_v38, %s1923_s12  ;;  %s2688_s12 = sld [smem:[#allocation2 + $0x1a]] }
 0xa23   :  { %1564 = vrot.lane.b32.xlu0 %v2183_v37, %s1924_s13 }
 0xa24   :  { %1561 = vrot.lane.b32.xlu1 %v2186_v38, %s1924_s13  ;;  %s2715_s13 = sld [smem:[#allocation2 + $0x1b]] }
 0xa25   :  { %v1014_v40 = vpop.permute.xlu0 %1013 }
 0xa26   :  { %v1010_v41 = vpop.permute.xlu1 %1009 }
 0xa27   :  { %1584 = vrot.lane.b32.xlu0 %v2183_v37, %s1925_s14  ;;  %v1015_v61 = vsel %vm114_vm0, %v1014_v40, %v1010_v41  ;;  %v1018_v62 = vsel %vm114_vm0, %v1010_v41, %v1014_v40  ;;  %vm1081_vm0 = vcmp.ge.s32.totalorder %v1984_v18, 5 }
 0xa28   :  { %1581 = vrot.lane.b32.xlu1 %v2186_v38, %s1925_s14  ;;  %v1019_v9 = vsel %vm107_vm1, %v1018_v62, 0.0  ;;  %v1020_v10 = vsel %vm108_vm2, %v1015_v61, 0.0  ;;  %vm1100_vm1 = vcmp.ge.s32.totalorder %v1984_v18, 6  ;;  %vm1101_vm2 = vcmp.ge.s32.totalorder %v1987_v20, 6  ;;  %s2728_s14 = sld [smem:[#allocation2 + $0x1c]] }
 0xa29   :  { %v1031_v42 = vpop.permute.xlu0 %1030  ;;  %v1022_v22 = vmul.f32 %v1021_v58, %v1019_v9  ;;  %v1023_v23 = vmul.f32 %v1021_v58, %v1020_v10  ;;  %v1174_v62 = vstv %s2334_s23 }
 0xa2a   :  { %v1028_v43 = vpop.permute.xlu1 %1027 }
 0xa2b   :  { %1604 = vrot.lane.b32.xlu0 %v2183_v37, %s1926_s15  ;;  %v1032_v7 = vsel %vm96_vm3, %v1031_v42, %v1028_v43  ;;  %v1035_v8 = vsel %vm96_vm3, %v1028_v43, %v1031_v42  ;;  %vm1120_vm3 = vcmp.ge.s32.totalorder %v1984_v18, 7  ;;  %v1024_v36 = vadd.f32 %v1022_v22, %v1005_v2 }
 0xa2c   :  { %1601 = vrot.lane.b32.xlu1 %v2186_v38, %s1926_s15  ;;  %v1036_v15 = vsel %vm87_vm5, %v1035_v8, 0.0  ;;  %v1037_v16 = vsel %vm88_vm4, %v1032_v7, 0.0  ;;  %vm1121_vm4 = vcmp.ge.s32.totalorder %v1987_v20, 7  ;;  %vm1127_vm5 = vcmask 56320   ;;  %s2734_s15 = sld [smem:[#allocation2 + $0x1d]] }
 0xa2d   :  { %v1050_v44 = vpop.permute.xlu0 %1049  ;;  %v1039_v27 = vmul.f32 %v1038_v63, %v1036_v15  ;;  %v1040_v28 = vmul.f32 %v1038_v63, %v1037_v16  ;;  %v1025_v37 = vadd.f32 %v1023_v23, %v1006_v5  ;;  %v1194_v63 = vstv %s2336_s24 }
 0xa2e   :  { %v1047_v45 = vpop.permute.xlu1 %1046 }
 0xa2f   :  { %v1052_v19 = vsel %vm1051_vm7, %v1050_v44, %v1047_v45  ;;  %v1055_v21 = vsel %vm1051_vm7, %v1047_v45, %v1050_v44  ;;  %v1041_v43 = vadd.f32 %v1039_v27, %v1024_v36  ;;  %v1042_v44 = vadd.f32 %v1040_v28, %v1025_v37 }
 0xa30   :  { %v1056_v29 = vsel %vm1044_vm15, %v1055_v21, 0.0  ;;  %v1057_v30 = vsel %vm1045_vm6, %v1052_v19, 0.0  ;;  %vm1160_vm15 = vcmp.ge.s32.totalorder %v1984_v18, 9  ;;  %vm1167_vm6 = vcmask 72704  }
 0xa31   :  { %v1068_v46 = vpop.permute.xlu0 %1067  ;;  %v1059_v41 = vmul.f32 %v1058_v1, %v1056_v29  ;;  %v1060_v42 = vmul.f32 %v1058_v1, %v1057_v30  ;;  %vm1187_vm7 = vcmask 80896   ;;  %v1253_v36 = vstv %s2384_s1 }
 0xa32   :  { %v1065_v47 = vpop.permute.xlu1 %1064 }
 0xa33   :  { %v1069_v24 = vsel %vm334_vm12, %v1068_v46, %v1065_v47  ;;  %v1072_v25 = vsel %vm334_vm12, %v1065_v47, %v1068_v46  ;;  %vm1147_vm12 = vcmask 64512   ;;  %v1061_v1 = vadd.f32 %v1059_v41, %v1041_v43 }
 0xa34   :  { %v1073_v32 = vsel %vm325_vm13, %v1072_v25, 0.0  ;;  %v1074_v33 = vsel %vm326_vm14, %v1069_v24, 0.0  ;;  %vm1140_vm13 = vcmp.ge.s32.totalorder %v1984_v18, 8  ;;  %vm1141_vm14 = vcmp.ge.s32.totalorder %v1987_v20, 8 }
 0xa35   :  { %v2256_v48 = vpop.permute.xlu0 %1086  ;;  %v1076_v45 = vmul.f32 %v1075_v11, %v1073_v32  ;;  %v1077_v46 = vmul.f32 %v1075_v11, %v1074_v33  ;;  %v1062_v2 = vadd.f32 %v1060_v42, %v1042_v44  ;;  %v1214_v11 = vstv %s2352_s4 }
 0xa36   :  { %v2258_v49 = vpop.permute.xlu1 %1083  ;;  %v1234_v33 = vstv %s2382_s25 }
 0xa37   :  { %v1088_v38 = vsel %vm240_vm11, %v2256_v48, %v2258_v49  ;;  %v1091_v40 = vsel %vm240_vm11, %v2258_v49, %v2256_v48  ;;  %vm1161_vm11 = vcmp.ge.s32.totalorder %v1987_v20, 9 }
 0xa38   :  { %v1092_v48 = vsel %vm1081_vm0, %v1091_v40, 0.0  ;;  %v1093_v49 = vsel %vm1082_vm8, %v1088_v38, 0.0  ;;  %vm1180_vm0 = vcmp.ge.s32.totalorder %v1984_v18, 10  ;;  %vm1181_vm8 = vcmp.ge.s32.totalorder %v1987_v20, 10 }
 0xa39   :  { %v2260_v50 = vpop.permute.xlu0 %1105  ;;  %v1096_v7 = vmul.f32 %v1094_v12, %v1093_v49 }
 0xa3a   :  { %v2262_v51 = vpop.permute.xlu1 %1102 }
 0xa3b   :  { %v1108_v60 = vsel %vm1107_vm9, %v2260_v50, %v2262_v51  ;;  %v1111_v58 = vsel %vm1107_vm9, %v2262_v51, %v2260_v50  ;;  %vm1207_vm9 = vcmask 89088   ;;  %v1095_v51 = vmul.f32 %v1094_v12, %v1092_v48 }
 0xa3c   :  { %v1112_v8 = vsel %vm1100_vm1, %v1111_v58, 0.0  ;;  %v1113_v9 = vsel %vm1101_vm2, %v1108_v60, 0.0  ;;  %vm1200_vm1 = vcmp.ge.s32.totalorder %v1984_v18, 11  ;;  %vm1201_vm2 = vcmp.ge.s32.totalorder %v1987_v20, 11 }
 0xa3d   :  { %v2264_v52 = vpop.permute.xlu0 %1125  ;;  %v1115_v22 = vmul.f32 %v1114_v13, %v1112_v8  ;;  %v1116_v23 = vmul.f32 %v1114_v13, %v1113_v9  ;;  %v1273_v58 = vstv %s2429_s0 }
 0xa3e   :  { %v2266_v17 = vpop.permute.xlu1 %1122 }
 0xa3f   :  { %v1128_v5 = vsel %vm1127_vm5, %v2264_v52, %v2266_v17  ;;  %v1131_v50 = vsel %vm1127_vm5, %v2266_v17, %v2264_v52  ;;  %v1078_v52 = vadd.f32 %v1076_v45, %v1061_v1  ;;  %v1079_v17 = vadd.f32 %v1077_v46, %v1062_v2 }
 0xa40   :  { %vm1227_vm5 = vcmask 97280   ;;  %v1132_v16 = vsel %vm1120_vm3, %v1131_v50, 0.0  ;;  %v1133_v12 = vsel %vm1121_vm4, %v1128_v5, 0.0  ;;  %vm1220_vm3 = vcmp.ge.s32.totalorder %v1984_v18, 12 }
 0xa41   :  { %v2268_v53 = vpop.permute.xlu0 %1145  ;;  %vm1221_vm4 = vcmp.ge.s32.totalorder %v1987_v20, 12  ;;  %v1135_v27 = vmul.f32 %v1134_v26, %v1132_v16  ;;  %v1136_v28 = vmul.f32 %v1134_v26, %v1133_v12 }
 0xa42   :  { %v2270_v56 = vpop.permute.xlu1 %1142 }
 0xa43   :  { %v1148_v19 = vsel %vm1147_vm12, %v2268_v53, %v2270_v56  ;;  %v1151_v21 = vsel %vm1147_vm12, %v2270_v56, %v2268_v53  ;;  %v1097_v53 = vadd.f32 %v1095_v51, %v1078_v52  ;;  %v1098_v56 = vadd.f32 %v1096_v7, %v1079_v17 }
 0xa44   :  { %vm1240_vm12 = vcmp.ge.s32.totalorder %v1984_v18, 13  ;;  %v1313_v52 = vstv %s2453_s27 }
 0xa45   :  { %v2276_v54 = vpop.permute.xlu0 %1165  ;;  %v1117_v26 = vadd.f32 %v1115_v22, %v1097_v53  ;;  %v1118_v37 = vadd.f32 %v1116_v23, %v1098_v56 }
 0xa46   :  { %v2280_v59 = vpop.permute.xlu1 %1162 }
 0xa47   :  { %v1168_v24 = vsel %vm1167_vm6, %v2276_v54, %v2280_v59  ;;  %v1171_v25 = vsel %vm1167_vm6, %v2280_v59, %v2276_v54  ;;  %v1152_v54 = vsel %vm1140_vm13, %v1151_v21, 0.0  ;;  %v1153_v59 = vsel %vm1141_vm14, %v1148_v19, 0.0 }
 0xa48   :  { %v1172_v30 = vsel %vm1160_vm15, %v1171_v25, 0.0  ;;  %v1173_v32 = vsel %vm1161_vm11, %v1168_v24, 0.0  ;;  %vm1241_vm13 = vcmp.ge.s32.totalorder %v1987_v20, 13  ;;  %v1155_v41 = vmul.f32 %v1154_v34, %v1152_v54 }
 0xa49   :  { %v2288_v55 = vpop.permute.xlu0 %1185  ;;  %v1156_v42 = vmul.f32 %v1154_v34, %v1153_v59  ;;  %vm1259_vm14 = vcmp.ge.s32.totalorder %v1984_v18, 14  ;;  %vm1266_vm15 = vcmask 113664   ;;  %v1137_v44 = vadd.f32 %v1135_v27, %v1117_v26 }
 0xa4a   :  { %v2290_v57 = vpop.permute.xlu1 %1182  ;;  %v1138_v45 = vadd.f32 %v1136_v28, %v1118_v37  ;;  %v1175_v46 = vmul.f32 %v1174_v62, %v1172_v30  ;;  %vm1260_vm6 = vcmp.ge.s32.totalorder %v1987_v20, 14  ;;  %vm1286_vm11 = vcmask 121856  }
 0xa4b   :  { %v1188_v38 = vsel %vm1187_vm7, %v2288_v55, %v2290_v57  ;;  %v1191_v40 = vsel %vm1187_vm7, %v2290_v57, %v2288_v55  ;;  %v1176_v55 = vmul.f32 %v1174_v62, %v1173_v32  ;;  %v1293_v62 = vstv %s2431_s26 }
 0xa4c   :  { %v1192_v48 = vsel %vm1180_vm0, %v1191_v40, 0.0  ;;  %v1193_v34 = vsel %vm1181_vm8, %v1188_v38, 0.0  ;;  %v1157_v1 = vadd.f32 %v1155_v41, %v1137_v44  ;;  %v1158_v2 = vadd.f32 %v1156_v42, %v1138_v45 }
 0xa4d   :  { %v2298_v0 = vpop.permute.xlu0 %1205  ;;  %vm1279_vm7 = vcmp.ge.s32.totalorder %v1984_v18, 15  ;;  %vm1280_vm0 = vcmp.ge.s32.totalorder %v1987_v20, 15  ;;  %vm1306_vm8 = vcmask 130048   ;;  %v1196_v51 = vmul.f32 %v1194_v63, %v1193_v34 }
 0xa4e   :  { %v2305_v6 = vpop.permute.xlu1 %1202  ;;  %v1178_v9 = vadd.f32 %v1176_v55, %v1158_v2  ;;  %v1353_v54 = vstv %s2491_s29  ;;  %v1373_v55 = vstv %s2538_s30 }
 0xa4f   :  { %v1208_v49 = vsel %vm1207_vm9, %v2298_v0, %v2305_v6  ;;  %v1211_v60 = vsel %vm1207_vm9, %v2305_v6, %v2298_v0  ;;  %v1195_v6 = vmul.f32 %v1194_v63, %v1192_v48  ;;  %vm1326_vm9 = vcmask 138240  }
 0xa50   :  { %v1212_v7 = vsel %vm1200_vm1, %v1211_v60, 0.0  ;;  %v1213_v8 = vsel %vm1201_vm2, %v1208_v49, 0.0  ;;  %vm1300_vm1 = vcmp.ge.s32.totalorder %v1987_v20, 16  ;;  %vm1320_vm2 = vcmp.ge.s32.totalorder %v1987_v20, 17 }
 0xa51   :  { %v2320_v14 = vpop.permute.xlu0 %1225  ;;  %v1215_v19 = vmul.f32 %v1214_v11, %v1212_v7  ;;  %v1216_v21 = vmul.f32 %v1214_v11, %v1213_v8  ;;  %v1333_v11 = vstv %s2474_s28  ;;  %v1393_v48 = vstv %s2540_s6 }
 0xa52   :  { %v2330_v39 = vpop.permute.xlu1 %1222 }
 0xa53   :  { %v1228_v5 = vsel %vm1227_vm5, %v2320_v14, %v2330_v39  ;;  %v1231_v50 = vsel %vm1227_vm5, %v2330_v39, %v2320_v14  ;;  %v1177_v39 = vadd.f32 %v1175_v46, %v1157_v1  ;;  %vm1299_vm5 = vcmp.ge.s32.totalorder %v1984_v18, 16 }
 0xa54   :  { %v1232_v17 = vsel %vm1220_vm3, %v1231_v50, 0.0  ;;  %v1233_v16 = vsel %vm1221_vm4, %v1228_v5, 0.0  ;;  %vm1346_vm3 = vcmask 146432   ;;  %vm1339_vm4 = vcmp.ge.s32.totalorder %v1984_v18, 18 }
 0xa55   :  { %v2345_v31 = vpop.permute.xlu0 %1245  ;;  %v1235_v53 = vmul.f32 %v1234_v33, %v1232_v17 }
 0xa56   :  { %v2354_v35 = vpop.permute.xlu1 %1242 }
 0xa57   :  { %v1247_v63 = vsel %vm137_vm10, %v2345_v31, %v2354_v35  ;;  %v1250_v12 = vsel %vm137_vm10, %v2354_v35, %v2345_v31  ;;  %v1197_v31 = vadd.f32 %v1195_v6, %v1177_v39  ;;  %v1198_v35 = vadd.f32 %v1196_v51, %v1178_v9 }
 0xa58   :  { %vm1319_vm10 = vcmp.ge.s32.totalorder %v1984_v18, 17  ;;  %v1252_v56 = vsel %vm1241_vm13, %v1247_v63, 0.0  ;;  %vm1359_vm13 = vcmp.ge.s32.totalorder %v1984_v18, 19  ;;  %v1413_v6 = vstv %s2560_s7 }
 0xa59   :  { %v2365_v47 = vpop.permute.xlu0 %1264  ;;  %v1217_v59 = vadd.f32 %v1215_v19, %v1197_v31  ;;  %v1218_v30 = vadd.f32 %v1216_v21, %v1198_v35  ;;  %v1255_v38 = vmul.f32 %v1253_v36, %v1252_v56  ;;  %v1433_v31 = vstv %s2598_s8 }
 0xa5a   :  { %v2377_v61 = vpop.permute.xlu1 %1261 }
 0xa5b   :  { %v1267_v22 = vsel %vm1266_vm15, %v2365_v47, %v2377_v61  ;;  %v1270_v23 = vsel %vm1266_vm15, %v2377_v61, %v2365_v47  ;;  %v1236_v47 = vmul.f32 %v1234_v33, %v1233_v16  ;;  %v1251_v61 = vsel %vm1240_vm12, %v1250_v12, 0.0 }
 0xa5c   :  { %v1271_v27 = vsel %vm1259_vm14, %v1270_v23, 0.0  ;;  %v1272_v28 = vsel %vm1260_vm6, %v1267_v22, 0.0  ;;  %vm1340_vm12 = vcmp.ge.s32.totalorder %v1987_v20, 18  ;;  %v1254_v37 = vmul.f32 %v1253_v36, %v1251_v61 }
 0xa5d   :  { %v2402_v10 = vpop.permute.xlu0 %1284  ;;  %vm1366_vm14 = vcmask 154624   ;;  %v1237_v41 = vadd.f32 %v1235_v53, %v1217_v59  ;;  %v1238_v42 = vadd.f32 %v1236_v47, %v1218_v30  ;;  %vm1360_vm15 = vcmp.ge.s32.totalorder %v1987_v20, 19 }
 0xa5e   :  { %v2405_v15 = vpop.permute.xlu1 %1281  ;;  %vm1386_vm6 = vcmask 162816  }
 0xa5f   :  { %v1287_v32 = vsel %vm1286_vm11, %v2402_v10, %v2405_v15  ;;  %v1290_v33 = vsel %vm1286_vm11, %v2405_v15, %v2402_v10  ;;  %v1274_v10 = vmul.f32 %v1273_v58, %v1271_v27  ;;  %v1275_v15 = vmul.f32 %v1273_v58, %v1272_v28 }
 0xa60   :  { %v1291_v44 = vsel %vm1279_vm7, %v1290_v33, 0.0  ;;  %v1292_v45 = vsel %vm1280_vm0, %v1287_v32, 0.0  ;;  %v1256_v49 = vadd.f32 %v1254_v37, %v1237_v41  ;;  %v1257_v60 = vadd.f32 %v1255_v38, %v1238_v42 }
 0xa61   :  { %v2435_v13 = vpop.permute.xlu0 %1304  ;;  %vm1379_vm11 = vcmp.ge.s32.totalorder %v1984_v18, 20  ;;  %vm1380_vm7 = vcmp.ge.s32.totalorder %v1987_v20, 20  ;;  %vm1406_vm0 = vcmask 171008   ;;  %v1294_v1 = vmul.f32 %v1293_v62, %v1291_v44 }
 0xa62   :  { %v2445_v29 = vpop.permute.xlu1 %1301  ;;  %v1295_v2 = vmul.f32 %v1293_v62, %v1292_v45  ;;  %v1453_v28 = vstv %s2616_s9  ;;  %v1473_v41 = vstv %s2641_s10 }
 0xa63   :  { %v1307_v36 = vsel %vm1306_vm8, %v2435_v13, %v2445_v29  ;;  %v1310_v46 = vsel %vm1306_vm8, %v2445_v29, %v2435_v13  ;;  %vm1426_vm8 = vcmask 179200  }
 0xa64   :  { %v1311_v5 = vsel %vm1299_vm5, %v1310_v46, 0.0  ;;  %v1312_v50 = vsel %vm1300_vm1, %v1307_v36, 0.0  ;;  %vm1400_vm5 = vcmp.ge.s32.totalorder %v1987_v20, 21  ;;  %vm1419_vm1 = vcmp.ge.s32.totalorder %v1984_v18, 22 }
 0xa65   :  { %v2468_v43 = vpop.permute.xlu0 %1324  ;;  %v1314_v9 = vmul.f32 %v1313_v52, %v1311_v5  ;;  %v1315_v17 = vmul.f32 %v1313_v52, %v1312_v50 }
 0xa66   :  { %v2476_v57 = vpop.permute.xlu1 %1321 }
 0xa67   :  { %v1327_v58 = vsel %vm1326_vm9, %v2468_v43, %v2476_v57  ;;  %v1330_v13 = vsel %vm1326_vm9, %v2476_v57, %v2468_v43  ;;  %v1276_v43 = vadd.f32 %v1274_v10, %v1256_v49  ;;  %v1277_v57 = vadd.f32 %v1275_v15, %v1257_v60 }
 0xa68   :  { %v1331_v51 = vsel %vm1319_vm10, %v1330_v13, 0.0  ;;  %v1332_v7 = vsel %vm1320_vm2, %v1327_v58, 0.0  ;;  %vm1399_vm9 = vcmp.ge.s32.totalorder %v1984_v18, 21  ;;  %vm1420_vm10 = vcmp.ge.s32.totalorder %v1987_v20, 22 }
 0xa69   :  { %v2501_v0 = vpop.permute.xlu0 %1344  ;;  %v1334_v19 = vmul.f32 %v1333_v11, %v1331_v51  ;;  %v1335_v52 = vmul.f32 %v1333_v11, %v1332_v7  ;;  %vm1446_vm2 = vcmask 187392   ;;  %v1493_v13 = vstv %s2658_s11 }
 0xa6a   :  { %v2511_v14 = vpop.permute.xlu1 %1341 }
 0xa6b   :  { %v1347_v62 = vsel %vm1346_vm3, %v2501_v0, %v2511_v14  ;;  %v1350_v8 = vsel %vm1346_vm3, %v2511_v14, %v2501_v0  ;;  %v1296_v0 = vadd.f32 %v1294_v1, %v1276_v43  ;;  %v1297_v14 = vadd.f32 %v1295_v2, %v1277_v57 }
 0xa6c   :  { %v1351_v21 = vsel %vm1339_vm4, %v1350_v8, 0.0  ;;  %v1352_v22 = vsel %vm1340_vm12, %v1347_v62, 0.0  ;;  %vm1439_vm3 = vcmp.ge.s32.totalorder %v1984_v18, 23  ;;  %vm1440_vm4 = vcmp.ge.s32.totalorder %v1987_v20, 23 }
 0xa6d   :  { %v2536_v24 = vpop.permute.xlu0 %1364  ;;  %v1316_v11 = vadd.f32 %v1314_v9, %v1296_v0  ;;  %v1354_v56 = vmul.f32 %v1353_v54, %v1351_v21  ;;  %v1355_v27 = vmul.f32 %v1353_v54, %v1352_v22  ;;  %vm1466_vm12 = vcmask 195584  }
 0xa6e   :  { %v2545_v25 = vpop.permute.xlu1 %1361 }
 0xa6f   :  { %v1367_v16 = vsel %vm1366_vm14, %v2536_v24, %v2545_v25  ;;  %v1370_v63 = vsel %vm1366_vm14, %v2545_v25, %v2536_v24  ;;  %v1317_v25 = vadd.f32 %v1315_v17, %v1297_v14  ;;  %v1336_v59 = vadd.f32 %v1334_v19, %v1316_v11 }
 0xa70   :  { %v1371_v23 = vsel %vm1359_vm13, %v1370_v63, 0.0  ;;  %v1372_v24 = vsel %vm1360_vm15, %v1367_v16, 0.0  ;;  %vm1459_vm13 = vcmp.ge.s32.totalorder %v1984_v18, 24  ;;  %vm1460_vm14 = vcmp.ge.s32.totalorder %v1987_v20, 24 }
 0xa71   :  { %v2570_v26 = vpop.permute.xlu0 %1384  ;;  %v1337_v30 = vadd.f32 %v1335_v52, %v1317_v25  ;;  %v1374_v32 = vmul.f32 %v1373_v55, %v1371_v23  ;;  %v1375_v33 = vmul.f32 %v1373_v55, %v1372_v24  ;;  %vm1486_vm15 = vcmask 203776  }
 0xa72   :  { %v2577_v40 = vpop.permute.xlu1 %1381  ;;  %v1356_v10 = vadd.f32 %v1354_v56, %v1336_v59 }
 0xa73   :  { %v1387_v53 = vsel %vm1386_vm6, %v2570_v26, %v2577_v40  ;;  %v1390_v47 = vsel %vm1386_vm6, %v2577_v40, %v2570_v26  ;;  %v1357_v15 = vadd.f32 %v1355_v27, %v1337_v30  ;;  %vm1479_vm6 = vcmp.ge.s32.totalorder %v1984_v18, 25 }
 0xa74   :  { %v1391_v26 = vsel %vm1379_vm11, %v1390_v47, 0.0  ;;  %v1392_v37 = vsel %vm1380_vm7, %v1387_v53, 0.0  ;;  %vm1480_vm11 = vcmp.ge.s32.totalorder %v1987_v20, 25  ;;  %v1376_v49 = vadd.f32 %v1374_v32, %v1356_v10 }
 0xa75   :  { %v2596_v34 = vpop.permute.xlu0 %1404  ;;  %v1394_v36 = vmul.f32 %v1393_v48, %v1391_v26  ;;  %v1395_v46 = vmul.f32 %v1393_v48, %v1392_v37  ;;  %v1377_v60 = vadd.f32 %v1375_v33, %v1357_v15  ;;  %vm1506_vm7 = vcmask 211968  }
 0xa76   :  { %v1402_v29 = vpop.permute.xlu1 %1401  ;;  %v1553_v10 = vstv %s2728_s14 }
 0xa77   :  { %v1407_v38 = vsel %vm1406_vm0, %v2596_v34, %v1402_v29  ;;  %v1410_v54 = vsel %vm1406_vm0, %v1402_v29, %v2596_v34  ;;  %v1396_v7 = vadd.f32 %v1394_v36, %v1376_v49  ;;  %v1397_v62 = vadd.f32 %v1395_v46, %v1377_v60 }
 0xa78   :  { %v1411_v55 = vsel %vm1399_vm9, %v1410_v54, 0.0  ;;  %v1412_v34 = vsel %vm1400_vm5, %v1407_v38, 0.0  ;;  %vm1499_vm0 = vcmp.ge.s32.totalorder %v1984_v18, 26  ;;  %vm1526_vm9 = vcmask 220160  }
 0xa79   :  { %v1425_v39 = vpop.permute.xlu0 %1424  ;;  %v1414_v50 = vmul.f32 %v1413_v6, %v1411_v55  ;;  %v1415_v43 = vmul.f32 %v1413_v6, %v1412_v34  ;;  %vm1519_vm5 = vcmp.ge.s32.totalorder %v1984_v18, 27 }
 0xa7a   :  { %v1422_v12 = vpop.permute.xlu1 %1421 }
 0xa7b   :  { %v1427_v44 = vsel %vm1426_vm8, %v1425_v39, %v1422_v12  ;;  %v1430_v45 = vsel %vm1426_vm8, %v1422_v12, %v1425_v39  ;;  %vm1500_vm8 = vcmp.ge.s32.totalorder %v1987_v20, 26  ;;  %v1513_v12 = vstv %s2688_s12 }
 0xa7c   :  { %v1431_v29 = vsel %vm1419_vm1, %v1430_v45, 0.0  ;;  %v1432_v1 = vsel %vm1420_vm10, %v1427_v44, 0.0  ;;  %v1416_v14 = vadd.f32 %v1414_v50, %v1396_v7  ;;  %v1417_v19 = vadd.f32 %v1415_v43, %v1397_v62 }
 0xa7d   :  { %v1445_v35 = vpop.permute.xlu0 %1444  ;;  %v1434_v8 = vmul.f32 %v1433_v31, %v1431_v29  ;;  %v1435_v39 = vmul.f32 %v1433_v31, %v1432_v1  ;;  %vm1520_vm1 = vcmp.ge.s32.totalorder %v1987_v20, 27  ;;  %vm1539_vm10 = vcmp.ge.s32.totalorder %v1984_v18, 28 }
 0xa7e   :  { %v1442_v61 = vpop.permute.xlu1 %1441 }
 0xa7f   :  { %v1447_v2 = vsel %vm1446_vm2, %v1445_v35, %v1442_v61  ;;  %v1450_v48 = vsel %vm1446_vm2, %v1442_v61, %v1445_v35  ;;  %v1436_v24 = vadd.f32 %v1434_v8, %v1416_v14  ;;  %v1437_v31 = vadd.f32 %v1435_v39, %v1417_v19 }
 0xa80   :  { %v1451_v9 = vsel %vm1439_vm3, %v1450_v48, 0.0  ;;  %v1452_v6 = vsel %vm1440_vm4, %v1447_v2, 0.0  ;;  %vm1540_vm2 = vcmp.ge.s32.totalorder %v1987_v20, 28  ;;  %vm1546_vm3 = vcmask 228352  }
 0xa81   :  { %v1465_v40 = vpop.permute.xlu0 %1464  ;;  %v1454_v22 = vmul.f32 %v1453_v28, %v1451_v9  ;;  %v1455_v23 = vmul.f32 %v1453_v28, %v1452_v6  ;;  %v1533_v28 = vstv %s2715_s13  ;;  %vm1566_vm4 = vcmask 236544  }
 0xa82   :  { %v1462_v42 = vpop.permute.xlu1 %1461  ;;  %v1593_v6 = vstv %s2751_s2 }
 0xa83   :  { %v1467_v57 = vsel %vm1466_vm12, %v1465_v40, %v1462_v42  ;;  %v1470_v51 = vsel %vm1466_vm12, %v1462_v42, %v1465_v40  ;;  %v1456_v59 = vadd.f32 %v1454_v22, %v1436_v24  ;;  %v1457_v30 = vadd.f32 %v1455_v23, %v1437_v31 }
 0xa84   :  { %v1471_v16 = vsel %vm1459_vm13, %v1470_v51, 0.0  ;;  %v1472_v63 = vsel %vm1460_vm14, %v1467_v57, 0.0  ;;  %vm1559_vm12 = vcmp.ge.s32.totalorder %v1984_v18, 29  ;;  %vm1560_vm13 = vcmp.ge.s32.totalorder %v1987_v20, 29 }
 0xa85   :  { %v1485_v58 = vpop.permute.xlu0 %1484  ;;  %v1474_v35 = vmul.f32 %v1473_v41, %v1471_v16  ;;  %v1475_v11 = vmul.f32 %v1473_v41, %v1472_v63  ;;  %vm1586_vm14 = vcmask 244736  }
 0xa86   :  { %v1482_v5 = vpop.permute.xlu1 %1481 }
 0xa87   :  { %v1487_v52 = vsel %vm1486_vm15, %v1485_v58, %v1482_v5  ;;  %v1490_v21 = vsel %vm1486_vm15, %v1482_v5, %v1485_v58  ;;  %v1476_v41 = vadd.f32 %v1474_v35, %v1456_v59  ;;  %v1477_v42 = vadd.f32 %v1475_v11, %v1457_v30 }
 0xa88   :  { %v1491_v53 = vsel %vm1479_vm6, %v1490_v21, 0.0  ;;  %v1492_v47 = vsel %vm1480_vm11, %v1487_v52, 0.0  ;;  %vm1579_vm15 = vcmp.ge.s32.totalorder %v1984_v18, 30  ;;  %vm1580_vm6 = vcmp.ge.s32.totalorder %v1987_v20, 30 }
 0xa89   :  { %v1505_v17 = vpop.permute.xlu0 %1504  ;;  %v1494_v26 = vmul.f32 %v1493_v13, %v1491_v53  ;;  %v1495_v37 = vmul.f32 %v1493_v13, %v1492_v47  ;;  %v1573_v13 = vstv %s2734_s15  ;;  %vm1606_vm11 = vcmask 252928  }
 0xa8a   :  { %v1502_v0 = vpop.permute.xlu1 %1501  ;;  %v1613_v53 = vstv %s2767_s16 }
 0xa8b   :  { %v1507_v61 = vsel %vm1506_vm7, %v1505_v17, %v1502_v0  ;;  %v1510_v56 = vsel %vm1506_vm7, %v1502_v0, %v1505_v17  ;;  %v1496_v49 = vadd.f32 %v1494_v26, %v1476_v41  ;;  %v1497_v60 = vadd.f32 %v1495_v37, %v1477_v42 }
 0xa8c   :  { %v1511_v38 = vsel %vm1499_vm0, %v1510_v56, 0.0  ;;  %v1512_v54 = vsel %vm1500_vm8, %v1507_v61, 0.0  ;;  %vm1599_vm7 = vcmp.ge.s32.totalorder %v1984_v18, 31  ;;  %vm1600_vm0 = vcmp.ge.s32.totalorder %v1987_v20, 31 }
 0xa8d   :  { %v1525_v25 = vpop.permute.xlu0 %1524  ;;  %v1514_v55 = vmul.f32 %v1513_v12, %v1511_v38  ;;  %v1515_v34 = vmul.f32 %v1513_v12, %v1512_v54  ;;  %v1927_v12 = vmov 1966171168   ;;  %vm1638_vm8 = vcmp.lt.s32.totalorder %v35_v3, 256 }
 0xa8e   :  { %v1522_v27 = vpop.permute.xlu1 %1521  ;;  %v1622_v0 = vunpack.c.l.s4 %v1927_v12 }
 0xa8f   :  { %v1527_v32 = vsel %vm1526_vm9, %v1525_v25, %v1522_v27  ;;  %v1530_v33 = vsel %vm1526_vm9, %v1522_v27, %v1525_v25  ;;  %v1516_v57 = vadd.f32 %v1514_v55, %v1496_v49  ;;  %v1517_v51 = vadd.f32 %v1515_v34, %v1497_v60 }
 0xa90   :  { %v1531_v44 = vsel %vm1519_vm5, %v1530_v33, 0.0  ;;  %v1532_v45 = vsel %vm1520_vm1, %v1527_v32, 0.0  ;;  %v1623_v61 = vunpack.c.0.s8 %v1622_v0 }
 0xa91   :  { %v1545_v40 = vpop.permute.xlu0 %1544  ;;  %v1534_v29 = vmul.f32 %v1533_v28, %v1531_v44  ;;  %v1535_v1 = vmul.f32 %v1533_v28, %v1532_v45 }
 0xa92   :  { %v1542_v15 = vpop.permute.xlu1 %1541  ;;  %v1626_v54 = vsub.s32 %v1623_v61, %v1966_v4 }
 0xa93   :  { %v1547_v36 = vsel %vm1546_vm3, %v1545_v40, %v1542_v15  ;;  %v1550_v46 = vsel %vm1546_vm3, %v1542_v15, %v1545_v40  ;;  %v1536_v17 = vadd.f32 %v1534_v29, %v1516_v57  ;;  %v1537_v16 = vadd.f32 %v1535_v1, %v1517_v51 }
 0xa94   :  { %v1551_v2 = vsel %vm1539_vm10, %v1550_v46, 0.0  ;;  %v1552_v48 = vsel %vm1540_vm2, %v1547_v36, 0.0 }
 0xa95   :  { %v1565_v58 = vpop.permute.xlu0 %1564  ;;  %v1554_v8 = vmul.f32 %v1553_v10, %v1551_v2  ;;  %v1555_v39 = vmul.f32 %v1553_v10, %v1552_v48 }
 0xa96   :  { %v1562_v5 = vpop.permute.xlu1 %1561 }
 0xa97   :  { %v1567_v50 = vsel %vm1566_vm4, %v1565_v58, %v1562_v5  ;;  %v1570_v43 = vsel %vm1566_vm4, %v1562_v5, %v1565_v58  ;;  %v1556_v24 = vadd.f32 %v1554_v8, %v1536_v17  ;;  %v1557_v31 = vadd.f32 %v1555_v39, %v1537_v16 }
 0xa98   :  { %v1571_v7 = vsel %vm1559_vm12, %v1570_v43, 0.0  ;;  %v1572_v62 = vsel %vm1560_vm13, %v1567_v50, 0.0 }
 0xa99   :  { %v1585_v9 = vpop.permute.xlu0 %1584  ;;  %v1574_v14 = vmul.f32 %v1573_v13, %v1571_v7  ;;  %v1575_v19 = vmul.f32 %v1573_v13, %v1572_v62 }
 0xa9a   :  { %v1582_v63 = vpop.permute.xlu1 %1581 }
 0xa9b   :  { %v1587_v52 = vsel %vm1586_vm14, %v1585_v9, %v1582_v63  ;;  %v1590_v21 = vsel %vm1586_vm14, %v1582_v63, %v1585_v9  ;;  %v1576_v56 = vadd.f32 %v1574_v14, %v1556_v24  ;;  %v1577_v27 = vadd.f32 %v1575_v19, %v1557_v31 }
 0xa9c   :  { %v1591_v22 = vsel %vm1579_vm15, %v1590_v21, 0.0  ;;  %v1592_v23 = vsel %vm1580_vm6, %v1587_v52, 0.0 }
 0xa9d   :  { %v1594_v35 = vmul.f32 %v1593_v6, %v1591_v22  ;;  %v1595_v11 = vmul.f32 %v1593_v6, %v1592_v23  ;;  %v1605_v25 = vpop.permute.xlu0 %1604 }
 0xa9e   :  { %v1602_v47 = vpop.permute.xlu1 %1601 }
 0xa9f   :  { %v1607_v28 = vsel %vm1606_vm11, %v1605_v25, %v1602_v47  ;;  %v1610_v59 = vsel %vm1606_vm11, %v1602_v47, %v1605_v25  ;;  %v1596_v33 = vadd.f32 %v1594_v35, %v1576_v56  ;;  %v1597_v18 = vadd.f32 %v1595_v11, %v1577_v27 }
 0xaa0   :  { %v1611_v30 = vsel %vm1599_vm7, %v1610_v59, 0.0  ;;  %v1612_v32 = vsel %vm1600_vm0, %v1607_v28, 0.0 }
 0xaa1   :  { %v1614_v26 = vmul.f32 %v1613_v53, %v1611_v30  ;;  %v1615_v20 = vmul.f32 %v1613_v53, %v1612_v32 }
 0xaa3   :  { %v1616_v37 = vadd.f32 %v1614_v26, %v1596_v33  ;;  %v1617_v38 = vadd.f32 %v1615_v20, %v1597_v18 }
 0xaa5   :  { %v1620_v40 = vcombine.high %v1616_v37, %v1617_v38 }
 0xaa7   :  { %v1627_v41 = vrot.slane %v1620_v40, %v1626_v54 }
 0xaa9   :  { %v1634_v42 = vrot.slane %v1627_v41, %v1626_v54 }
 0xaab   :  { %1640 = vst.msk [vmem:[#allocation5] sm:$0x3] %vm1638_vm8, %v1634_v42 }
 0xaac   :  { %1876 = shalt.err (!%p1873_p9)
}
 0xaad   :  { %s1877_s21 = scalar_lea.hbm %s2806_s5, 32 }
 0xaae   :  { %p1878_p10 = scmp.ne.s32.totalorder %s2806_s5, %s1877_s21  ;;  %p1881_p11 = scmp.lt.u32.totalorder %s1877_s21, %s2806_s5 }
 0xab0   :  { %p1883_p12 = pnand %p1881_p11, %p1878_p10 }
 0xab2   :  { %1886 = shalt.err (!%p1883_p12)
}
 0xab3   :  { %1650 = dma.vmem_to_hbm [thread:$0]  %s1648_s17, 32, %s2806_s5, [#allocation3]  }
 0xab4   :  { %1889 = dma.done.wait [#allocation3], 32  }
 0xab5   :  { %1890 = vsyncadd [#allocation3], 4294967264 }
 0xab6   :  { %1654 = vsyncpa [#allocation3], 1 }
 0xab7   :  { %1655 = vsyncpa [#allocation4], 1 }

</bundles_post_ra>
